<compile_context>
chip_gen: v7x
topology: tpu7x:2x2x1
jax: 0.10.0
libtpu: 0.0.40
codegen_flags: <defaults>
</compile_context>

<pallas_src>
import functools

import jax
import jax.numpy as jnp
from jax.experimental import pallas as pl
from jax.experimental.pallas import tpu as pltpu

D_IN, D_H1, D_H2, D_OUT = 57, 256, 512, 948
D_OUT_PAD = 1024  # 948 -> 1024 (multiple of 128): unmasked lane-dense output stores


def mlp_kernel(x_ref, w1_ref, b1_ref, w2_ref, b2_ref, w3_ref, b3_ref, o_ref):
    # fc1 + ReLU  (bf16 operands, f32 accumulation; bias/ReLU in f32)
    h1 = jnp.dot(x_ref[...], w1_ref[...], preferred_element_type=jnp.float32)
    h1 = jnp.maximum(h1 + b1_ref[...], 0.0)
    # fc2 + ReLU
    h2 = jnp.dot(h1.astype(jnp.bfloat16), w2_ref[...],
                 preferred_element_type=jnp.float32)
    h2 = jnp.maximum(h2 + b2_ref[...], 0.0)
    # fc3 + Sigmoid (exp and approximate reciprocal both route to the EUP slot)
    z = jnp.dot(h2.astype(jnp.bfloat16), w3_ref[...],
                preferred_element_type=jnp.float32)
    z = z + b3_ref[...]
    o_ref[...] = pl.reciprocal(1.0 + jnp.exp(-z), approx=True)


def prepare_params(w1, b1, w2, b2, w3, b3):
    """One-time parameter prep, hoisted out of the forward path.

    Weights are cast to bf16 (MXU operands); fc3 weight/bias are zero-padded
    948 -> 1024 on the output lanes (zeros don't change the math and the
    padded lanes are sliced off by the consumer). Biases stay f32.
    """
    w3p = jnp.pad(w3, ((0, 0), (0, D_OUT_PAD - D_OUT)))
    b3p = jnp.pad(b3, ((0, 0), (0, D_OUT_PAD - D_OUT)))
    return (
        w1.astype(jnp.bfloat16), b1,
        w2.astype(jnp.bfloat16), b2,
        w3p.astype(jnp.bfloat16), b3p,
    )


def _pick_tb(B):
    # Multiple of 8. Goals: small batch-padding waste; enough grid tiles at
    # moderate batch for v7x 2-TC sharding + double-buffer overlap; bigger
    # tiles at large batch for step-overhead amortization; cap at 512 so the
    # per-step working set (bf16 weights + f32 out tiles) stays well under
    # v5e's 16 MiB default scoped VMEM.
    if B <= 128:
        return max(8, -(-B // 8) * 8)
    if B <= 1024:
        return 128
    if B <= 4096:
        return 256
    return 512


@jax.jit
def mlp_forward_padded(x, w1b, b1, w2b, b2, w3b, b3p):
    """Returns the PADDED output (B_pad, 1024) in f32.

    Consumers should slice [:B, :D_OUT] themselves (or consume the padded
    buffer directly) — keeping the slice out of the hot path avoids an extra
    full read+write pass over the output.
    """
    B = x.shape[0]
    TB = _pick_tb(B)
    B_pad = -(-B // TB) * TB
    n_tiles = B_pad // TB

    # Only batch padding; feature dim stays 57 (block last dim == full dim).
    # Cast x once to bf16 here: halves the streamed x DMA and feeds the MXU.
    xp = jnp.pad(x.astype(jnp.bfloat16), ((0, B_pad - B), (0, 0)))

    def streamed(shape):
        # Batch-tiled, double-buffered stream.
        return pl.BlockSpec(shape, lambda i: (i, 0))

    def resident(shape):
        # Same block every grid step -> DMA'd once, stays resident in VMEM.
        # (Optionally pipeline_mode=pl.Buffered(1) at very large TB; not needed
        #  here since VMEM is nowhere near capacity at TB<=512.)
        return pl.BlockSpec(shape, lambda i: (0, 0))

    flops = 2 * B_pad * (D_IN * D_H1 + D_H1 * D_H2 + D_H2 * D_OUT_PAD)
    bytes_accessed = (
        2 * B_pad * D_IN                                       # x in (bf16)
        + 4 * B_pad * D_OUT_PAD                                # out (f32)
        + 2 * (D_IN * D_H1 + D_H1 * D_H2 + D_H2 * D_OUT_PAD)   # weights (bf16)
        + 4 * (D_H1 + D_H2 + D_OUT_PAD)                        # biases (f32)
    )

    out_pad = pl.pallas_call(
        mlp_kernel,
        out_shape=jax.ShapeDtypeStruct((B_pad, D_OUT_PAD), jnp.float32),
        grid=(n_tiles,),
        in_specs=[
            streamed((TB, D_IN)),
            resident((D_IN, D_H1)),
            resident((1, D_H1)),
            resident((D_H1, D_H2)),
            resident((1, D_H2)),
            resident((D_H2, D_OUT_PAD)),
            resident((1, D_OUT_PAD)),
        ],
        out_specs=streamed((TB, D_OUT_PAD)),
        compiler_params=pltpu.CompilerParams(
            dimension_semantics=("parallel",),
        ),
        cost_estimate=pl.CostEstimate(
            flops=flops,
            transcendentals=2 * B_pad * D_OUT_PAD,  # exp + reciprocal
            bytes_accessed=bytes_accessed,
        ),
    )(xp, w1b, b1, w2b, b2, w3b, b3p)

    return out_pad


def mlp_forward(x, prepared_params):
    """Convenience wrapper: returns (B, 948). The slice is a separate XLA op;
    performance-critical consumers should use mlp_forward_padded directly."""
    B = x.shape[0]
    return mlp_forward_padded(x, *prepared_params)[:B, :D_OUT]


def init_params(key):
    # Deterministic init mimicking PyTorch nn.Linear default:
    # U(-1/sqrt(fan_in), 1/sqrt(fan_in)) for both weight and bias.
    ks = jax.random.split(key, 6)

    def lin(kw, kb, fan_in, fan_out):
        bound = 1.0 / (fan_in ** 0.5)
        # stored as (in, out) so the kernel computes x @ W + b
        w = jax.random.uniform(kw, (fan_in, fan_out), jnp.float32, -bound, bound)
        b = jax.random.uniform(kb, (1, fan_out), jnp.float32, -bound, bound)
        return w, b

    w1, b1 = lin(ks[0], ks[1], D_IN, D_H1)
    w2, b2 = lin(ks[2], ks[3], D_H1, D_H2)
    w3, b3 = lin(ks[4], ks[5], D_H2, D_OUT)
    return w1, b1, w2, b2, w3, b3


def _ref_forward(x, w1, b1, w2, b2, w3, b3):
    # Pure-f32 reference (matches the PyTorch module's math).
    h = jnp.maximum(x @ w1 + b1, 0.0)
    h = jnp.maximum(h @ w2 + b2, 0.0)
    return jax.nn.sigmoid(h @ w3 + b3)


if __name__ == "__main__":
    key = jax.random.PRNGKey(0)
    k_param, k_x1, k_x2, k_x3 = jax.random.split(key, 4)
    params = init_params(k_param)
    prepared = prepare_params(*params)

    # bf16 matmul operands + approx reciprocal => compare against the f32
    # reference with a mixed-precision tolerance (outputs are sigmoid in [0,1]).
    TOL = 1e-2

    # Small batch (single grid step).
    B = 8
    x = jax.random.uniform(k_x1, (B, D_IN), jnp.float32)  # knowledge-state-like input
    out = jax.block_until_ready(mlp_forward(x, prepared))
    ref = _ref_forward(x, *params)
    assert out.shape == (B, D_OUT)
    assert jnp.max(jnp.abs(out - ref)) < TOL

    # Larger batch exercising the multi-tile grid path (TB=128 -> 4 tiles).
    B2 = 512
    x2 = jax.random.uniform(k_x2, (B2, D_IN), jnp.float32)
    out2_pad = jax.block_until_ready(mlp_forward_padded(x2, *prepared))
    out2 = out2_pad[:B2, :D_OUT]
    ref2 = _ref_forward(x2, *params)
    assert out2.shape == (B2, D_OUT)
    assert jnp.max(jnp.abs(out2 - ref2)) < TOL

    # Ragged batch exercising the padded-tail path (B=260 -> TB=128, B_pad=384).
    B3 = 260
    x3 = jax.random.uniform(k_x3, (B3, D_IN), jnp.float32)
    out3 = jax.block_until_ready(mlp_forward(x3, prepared))
    ref3 = _ref_forward(x3, *params)
    assert out3.shape == (B3, D_OUT)
    assert jnp.max(jnp.abs(out3 - ref3)) < TOL

    print("KERNEL_OK")
</pallas_src>

<mosaic_0001>
module attributes {stable_mosaic.version = 11 : i64} {
  func.func @mlp_kernel(%arg0: i32, %arg1: memref<8x57xbf16, #tpu.memory_space<vmem>>, %arg2: memref<57x256xbf16, #tpu.memory_space<vmem>>, %arg3: memref<1x256xf32, #tpu.memory_space<vmem>>, %arg4: memref<256x512xbf16, #tpu.memory_space<vmem>>, %arg5: memref<1x512xf32, #tpu.memory_space<vmem>>, %arg6: memref<512x1024xbf16, #tpu.memory_space<vmem>>, %arg7: memref<1x1024xf32, #tpu.memory_space<vmem>>, %arg8: memref<8x1024xf32, #tpu.memory_space<vmem>>) attributes {dimension_semantics = [#tpu.dimension_semantics<parallel>], iteration_bounds = array<i64: 1>, scalar_prefetch = 0 : i64, scratch_operands = 0 : i64, tpu.core_type = #tpu.core_type<tc>, window_params = [{transform_indices = @transform_0, window_bounds = array<i64: 8, 57>}, {pipeline_mode = #tpu.pipeline_mode<synchronous>, transform_indices = @transform_1, window_bounds = array<i64: 57, 256>}, {pipeline_mode = #tpu.pipeline_mode<synchronous>, transform_indices = @transform_2, window_bounds = array<i64: 1, 256>}, {pipeline_mode = #tpu.pipeline_mode<synchronous>, transform_indices = @transform_3, window_bounds = array<i64: 256, 512>}, {pipeline_mode = #tpu.pipeline_mode<synchronous>, transform_indices = @transform_4, window_bounds = array<i64: 1, 512>}, {pipeline_mode = #tpu.pipeline_mode<synchronous>, transform_indices = @transform_5, window_bounds = array<i64: 512, 1024>}, {pipeline_mode = #tpu.pipeline_mode<synchronous>, transform_indices = @transform_6, window_bounds = array<i64: 1, 1024>}, {transform_indices = @transform_7, window_bounds = array<i64: 8, 1024>}]} {
    %c0 = arith.constant 0 : index
    %c0_0 = arith.constant 0 : index
    %0 = vector.load %arg1[%c0, %c0_0] : memref<8x57xbf16, #tpu.memory_space<vmem>>, vector<8x57xbf16>
    %c0_1 = arith.constant 0 : index
    %c0_2 = arith.constant 0 : index
    %1 = vector.load %arg2[%c0_1, %c0_2] : memref<57x256xbf16, #tpu.memory_space<vmem>>, vector<57x256xbf16>
    %cst = arith.constant dense<0.000000e+00> : vector<8x256xf32>
    %2 = tpu.matmul %0, %1, %cst {dimension_numbers = #tpu.dot_dimension_numbers<[1], [0], [0], [1], [0, 0, 1, 1], [], []>} : vector<8x57xbf16>, vector<57x256xbf16>, vector<8x256xf32> -> vector<8x256xf32>
    %c0_3 = arith.constant 0 : index
    %c0_4 = arith.constant 0 : index
    %3 = vector.load %arg3[%c0_3, %c0_4] : memref<1x256xf32, #tpu.memory_space<vmem>>, vector<1x256xf32>
    %4 = vector.broadcast %3 : vector<1x256xf32> to vector<8x256xf32>
    %5 = arith.addf %2, %4 : vector<8x256xf32>
    %cst_5 = arith.constant 0.000000e+00 : f32
    %6 = vector.broadcast %cst_5 : f32 to vector<8x256xf32>
    %7 = arith.maximumf %5, %6 : vector<8x256xf32>
    %8 = arith.truncf %7 : vector<8x256xf32> to vector<8x256xbf16>
    %c0_6 = arith.constant 0 : index
    %c0_7 = arith.constant 0 : index
    %9 = vector.load %arg4[%c0_6, %c0_7] : memref<256x512xbf16, #tpu.memory_space<vmem>>, vector<256x512xbf16>
    %cst_8 = arith.constant dense<0.000000e+00> : vector<8x512xf32>
    %10 = tpu.matmul %8, %9, %cst_8 {dimension_numbers = #tpu.dot_dimension_numbers<[1], [0], [0], [1], [0, 0, 1, 1], [], []>} : vector<8x256xbf16>, vector<256x512xbf16>, vector<8x512xf32> -> vector<8x512xf32>
    %c0_9 = arith.constant 0 : index
    %c0_10 = arith.constant 0 : index
    %11 = vector.load %arg5[%c0_9, %c0_10] : memref<1x512xf32, #tpu.memory_space<vmem>>, vector<1x512xf32>
    %12 = vector.broadcast %11 : vector<1x512xf32> to vector<8x512xf32>
    %13 = arith.addf %10, %12 : vector<8x512xf32>
    %cst_11 = arith.constant 0.000000e+00 : f32
    %14 = vector.broadcast %cst_11 : f32 to vector<8x512xf32>
    %15 = arith.maximumf %13, %14 : vector<8x512xf32>
    %16 = arith.truncf %15 : vector<8x512xf32> to vector<8x512xbf16>
    %c0_12 = arith.constant 0 : index
    %c0_13 = arith.constant 0 : index
    %17 = vector.load %arg6[%c0_12, %c0_13] : memref<512x1024xbf16, #tpu.memory_space<vmem>>, vector<512x1024xbf16>
    %cst_14 = arith.constant dense<0.000000e+00> : vector<8x1024xf32>
    %18 = tpu.matmul %16, %17, %cst_14 {dimension_numbers = #tpu.dot_dimension_numbers<[1], [0], [0], [1], [0, 0, 1, 1], [], []>} : vector<8x512xbf16>, vector<512x1024xbf16>, vector<8x1024xf32> -> vector<8x1024xf32>
    %c0_15 = arith.constant 0 : index
    %c0_16 = arith.constant 0 : index
    %19 = vector.load %arg7[%c0_15, %c0_16] : memref<1x1024xf32, #tpu.memory_space<vmem>>, vector<1x1024xf32>
    %20 = vector.broadcast %19 : vector<1x1024xf32> to vector<8x1024xf32>
    %21 = arith.addf %18, %20 : vector<8x1024xf32>
    %cst_17 = arith.constant 0.000000e+00 : f32
    %22 = vector.broadcast %cst_17 : f32 to vector<8x1024xf32>
    %23 = arith.subf %22, %21 : vector<8x1024xf32>
    %24 = math.exp %23 : vector<8x1024xf32>
    %cst_18 = arith.constant 1.000000e+00 : f32
    %25 = vector.broadcast %cst_18 : f32 to vector<8x1024xf32>
    %26 = arith.addf %25, %24 : vector<8x1024xf32>
    %27 = tpu.reciprocal %26 {approx = true} : vector<8x1024xf32> -> vector<8x1024xf32>
    %c0_19 = arith.constant 0 : index
    %c0_20 = arith.constant 0 : index
    %28 = vector.load %arg8[%c0_19, %c0_20] : memref<8x1024xf32, #tpu.memory_space<vmem>>, vector<8x1024xf32>
    tpu.vector_store %arg8[%c0_19, %c0_20], %27 {strides = array<i32>} : memref<8x1024xf32, #tpu.memory_space<vmem>>, vector<8x1024xf32>,
    return
  }
  func.func @transform_0(%arg0: i32) -> (i32, i32) {
    %c0_i32 = arith.constant 0 : i32
    %c0_i32_0 = arith.constant 0 : i32
    return %arg0, %c0_i32 : i32, i32
  }
  func.func @transform_1(%arg0: i32) -> (i32, i32) {
    %c0_i32 = arith.constant 0 : i32
    %c0_i32_0 = arith.constant 0 : i32
    %c0_i32_1 = arith.constant 0 : i32
    return %c0_i32, %c0_i32_0 : i32, i32
  }
  func.func @transform_2(%arg0: i32) -> (i32, i32) {
    %c0_i32 = arith.constant 0 : i32
    %c0_i32_0 = arith.constant 0 : i32
    %c0_i32_1 = arith.constant 0 : i32
    return %c0_i32, %c0_i32_0 : i32, i32
  }
  func.func @transform_3(%arg0: i32) -> (i32, i32) {
    %c0_i32 = arith.constant 0 : i32
    %c0_i32_0 = arith.constant 0 : i32
    %c0_i32_1 = arith.constant 0 : i32
    return %c0_i32, %c0_i32_0 : i32, i32
  }
  func.func @transform_4(%arg0: i32) -> (i32, i32) {
    %c0_i32 = arith.constant 0 : i32
    %c0_i32_0 = arith.constant 0 : i32
    %c0_i32_1 = arith.constant 0 : i32
    return %c0_i32, %c0_i32_0 : i32, i32
  }
  func.func @transform_5(%arg0: i32) -> (i32, i32) {
    %c0_i32 = arith.constant 0 : i32
    %c0_i32_0 = arith.constant 0 : i32
    %c0_i32_1 = arith.constant 0 : i32
    return %c0_i32, %c0_i32_0 : i32, i32
  }
  func.func @transform_6(%arg0: i32) -> (i32, i32) {
    %c0_i32 = arith.constant 0 : i32
    %c0_i32_0 = arith.constant 0 : i32
    %c0_i32_1 = arith.constant 0 : i32
    return %c0_i32, %c0_i32_0 : i32, i32
  }
  func.func @transform_7(%arg0: i32) -> (i32, i32) {
    %c0_i32 = arith.constant 0 : i32
    %c0_i32_0 = arith.constant 0 : i32
    return %arg0, %c0_i32 : i32, i32
  }
}

</mosaic_0001>

<bundles_post_ra>
// kernel: mlp_forward_padded.1
= control target key start
LH: loop header
LB: loop body
LE: loop exit
PB: predicated region body
PF: predicated region fallthrough
CT: control target
= control target key end

     0   :  { %12 = vsyncpa [#allocation3], 0  ;;  %s3425_s0 = inlined_call_operand.vmem [shape: bf16[8,57], index: 0, kind: input, shape index: {}]   ;;  %s3426_s1 = inlined_call_operand.hbm [shape: bf16[57,256], index: 1, kind: input, shape index: {}]   ;;  %s3427_s2 = inlined_call_operand.vmem [shape: f32[1,256], index: 2, kind: input, shape index: {}]   ;;  %s3428_s3 = inlined_call_operand.hbm [shape: bf16[256,512], index: 3, kind: input, shape index: {}]   ;;  %s3429_s4 = inlined_call_operand.vmem [shape: f32[1,512], index: 4, kind: input, shape index: {}]   ;;  %s3430_s5 = inlined_call_operand.hbm [shape: bf16[512,1024], index: 5, kind: input, shape index: {}]   ;;  %s3431_s6 = inlined_call_operand.vmem [shape: f32[1,1024], index: 6, kind: input, shape index: {}]   ;;  %s3432_s7 = inlined_call_operand.hbm [shape: f32[8,1024], index: 7, kind: output, shape index: {}]  }
   0x1   :  { %13 = vsyncpa [#allocation6], 0 }
   0x2   :  { %14 = vsyncpa [#allocation4], 0  ;;  %s3252_s24 = smov [#allocation5]   ;;  %s3158_s28 = scalar_lea.hbm %s3428_s3, 8192 }
   0x3   :  { %s36_s25 = sshll.u32 %s3252_s24, 4  ;;  %p3159_p0 = scmp.ne.s32.totalorder %s3428_s3, %s3158_s28  ;;  %s37_s25 = int_to_ptr.vmem [resolvable:$true] %s36_s25 }
   0x4   :  { %p3162_p1 = scmp.lt.u32.totalorder %s3158_s28, %s3428_s3 }
   0x6   :  { %p3164_p2 = pnand %p3162_p1, %p3159_p0 }
   0x8   :  { %3167 = shalt.err (!%p3164_p2)
}
   0x9   :  { %s3168_s10 = scalar_lea.vmem %s37_s25, 8192  ;;  %p3173_p4 = scmp.lt.s32.totalorder %s37_s25, %s37_s25 }
   0xa   :  { %p3169_p3 = scmp.ne.s32.totalorder %s37_s25, %s3168_s10  ;;  %p3174_p5 = scmp.lt.s32.totalorder %s3168_s10, %s3168_s10 }
   0xc   :  { %p3175_p6 = por %p3174_p5, %p3173_p4 }
   0xe   :  { %p3176_p7 = pnand %p3175_p6, %p3169_p3 }
  0x10   :  { %3179 = shalt.err (!%p3176_p7)
}
  0x11   :  { %s3253_s11 = smov 256   ;;  %s3254_s12 = smov 16  }
  0x12   :  { %42 = dma.hbm_to_vmem [thread:$0]  %s3428_s3, 8192, %s37_s25, [#allocation6], %s3253_s11, %s3253_s11, %s3254_s12  }
  0x13   :  { %s3255_s15 = smov [#allocation2]   ;;  %s3180_s19 = scalar_lea.hbm %s3426_s1, 1024 }
  0x14   :  { %s22_s16 = sshll.u32 %s3255_s15, 4  ;;  %p3181_p8 = scmp.ne.s32.totalorder %s3426_s1, %s3180_s19  ;;  %s23_s16 = int_to_ptr.vmem [resolvable:$true] %s22_s16 }
  0x15   :  { %p3184_p9 = scmp.lt.u32.totalorder %s3180_s19, %s3426_s1 }
  0x17   :  { %p3186_p10 = pnand %p3184_p9, %p3181_p8 }
  0x19   :  { %3189 = shalt.err (!%p3186_p10)
}
  0x1a   :  { %s3190_s24 = scalar_lea.vmem %s23_s16, 1024  ;;  %p3195_p12 = scmp.lt.s32.totalorder %s23_s16, %s23_s16 }
  0x1b   :  { %p3191_p11 = scmp.ne.s32.totalorder %s23_s16, %s3190_s24  ;;  %p3196_p13 = scmp.lt.s32.totalorder %s3190_s24, %s3190_s24 }
  0x1d   :  { %p3197_p0 = por %p3196_p13, %p3195_p12 }
  0x1f   :  { %p3198_p1 = pnand %p3197_p0, %p3191_p11 }
  0x21   :  { %3201 = shalt.err (!%p3198_p1)
}
  0x22   :  { %s3256_s3 = smov 128   ;;  %s3257_s25 = smov 8  }
  0x23   :  { %28 = dma.hbm_to_vmem [thread:$0]  %s3426_s1, 1024, %s23_s16, [#allocation3], %s3256_s3, %s3256_s3, %s3257_s25  }
  0x24   :  { %s3258_s28 = smov [#allocation7]   ;;  %s3202_s9 = scalar_lea.hbm %s3430_s5, 32768 }
  0x25   :  { %s50_s29 = sshll.u32 %s3258_s28, 4  ;;  %p3203_p2 = scmp.ne.s32.totalorder %s3430_s5, %s3202_s9  ;;  %s51_s29 = int_to_ptr.vmem [resolvable:$true] %s50_s29 }
  0x26   :  { %p3206_p3 = scmp.lt.u32.totalorder %s3202_s9, %s3430_s5 }
  0x28   :  { %p3208_p4 = pnand %p3206_p3, %p3203_p2 }
  0x2a   :  { %3211 = shalt.err (!%p3208_p4)
}
  0x2b   :  { %s3212_s14 = scalar_lea.vmem %s51_s29, 32768  ;;  %p3217_p6 = scmp.lt.s32.totalorder %s51_s29, %s51_s29 }
  0x2c   :  { %p3213_p5 = scmp.ne.s32.totalorder %s51_s29, %s3212_s14  ;;  %p3218_p7 = scmp.lt.s32.totalorder %s3212_s14, %s3212_s14 }
  0x2e   :  { %p3219_p8 = por %p3218_p7, %p3217_p6 }
  0x30   :  { %p3220_p9 = pnand %p3219_p8, %p3213_p5 }
  0x32   :  { %3223 = shalt.err (!%p3220_p9)
}
  0x33   :  { %s3259_s1 = smov 512   ;;  %s3260_s15 = smov 32  }
  0x34   :  { %56 = dma.hbm_to_vmem [thread:$0]  %s3430_s5, 32768, %s51_s29, [#allocation6], %s3259_s1, %s3259_s1, %s3260_s15  }
  0x35   :  { %3246 = dma.done.wait [#allocation3], 1024  }
  0x36   :  { %3247 = vsyncadd [#allocation3], 4294966272 }
  0x37   :  { %3248 = dma.done.wait [#allocation6], 40960  }
  0x38   :  { %3249 = vsyncadd [#allocation6], 4294926336  ;;  %v3261_v0 = vmov 0   ;;  %vm132_vm0 = vcmask 1043456   ;;  %v3018_v1 = vld [vmem:[#allocation2 + $0x4] ss:$8 sps:$4 sm:$0xff]  }
  0x39   :  { %174 = vmatprep.mubr.bf16.mxu0 %v3261_v0  ;;  %v3020_v2 = vld [vmem:[#allocation2] ss:$8 sps:$4 sm:$0xff]   ;;  %142 = vmatprep.subr.bf16.mxu0 %v3018_v1  ;;  %v3021_v3 = vld [vmem:[#allocation2 + $0x14] ss:$8 sps:$4 sm:$0xff]   ;;  %vm133_vm1 = vcmask 1044480   ;;  %v3262_v4 = vmov 65535  }
  0x3a   :  { %v134_v5 = vsel %vm132_vm0, 4294967295, %v3262_v4  ;;  %143 = vmatpush1.bf16.msra.mxu0 %v3020_v2  ;;  %v3023_v6 = vld [vmem:[#allocation2 + $0x10] ss:$8 sps:$4 sm:$0xff]   ;;  %v3024_v7 = vld [vmem:[#allocation2 + $0x24] ss:$8 sps:$4 sm:$0xff]   ;;  %vm128_vm2 = vcmask 465920  }
  0x3b   :  { %144 = vmatprep.subr.bf16.mxu0 %v3021_v3  ;;  %v3027_v8 = vld [vmem:[#allocation2 + $0x34] ss:$8 sps:$4 sm:$0x1f]   ;;  %v135_v9 = vsel %vm133_vm1, %v134_v5, 0  ;;  %v3026_v11 = vld [vmem:[#allocation2 + $0x20] ss:$8 sps:$4 sm:$0xff]  }
  0x3c   :  { %v3030_v10 = vld [vmem:[#allocation5 + $0x4] ss:$16 sps:$4 sm:$0xff]   ;;  %v3029_v12 = vld [vmem:[#allocation2 + $0x30] ss:$8 sps:$4 sm:$0x1f]   ;;  %v140_v13 = vand.u32 %v3027_v8, %v135_v9 }
  0x3d   :  { %593 = vmatprep.subr.bf16.mxu1 %v3030_v10  ;;  %v3035_v14 = vld [vmem:[#allocation5] ss:$16 sps:$4 sm:$0xff]   ;;  %v3036_v15 = vld [vmem:[#allocation5 + $0x24] ss:$16 sps:$4 sm:$0xff]   ;;  %v137_v17 = vand.u32 %v3029_v12, %v135_v9  ;;  %v3034_v19 = vld [vmem:[#allocation5 + $0xc] ss:$16 sps:$4 sm:$0xff]  }
  0x3e   :  { %145 = vmatpush1.bf16.msra.mxu0 %v3023_v6  ;;  %594 = vmatpush1.bf16.msra.mxu1 %v3035_v14  ;;  %v3041_v16 = vld [vmem:[#allocation5 + $0x20] ss:$16 sps:$4 sm:$0xff]   ;;  %v3042_v18 = vld [vmem:[#allocation5 + $0x44] ss:$16 sps:$4 sm:$0xff]   ;;  %v69_v20 = vld [vmem:[%s3425_s0] sm:$0xf] }
  0x3f   :  { %146 = vmatprep.subr.bf16.mxu0 %v3024_v7  ;;  %595 = vmatprep.subr.bf16.mxu1 %v3036_v15  ;;  %v3047_v21 = vld [vmem:[#allocation5 + $0x40] ss:$16 sps:$4 sm:$0xff]   ;;  %v3032_v22 = vld [vmem:[#allocation5 + $0x8] ss:$16 sps:$4 sm:$0xff]   ;;  %v3048_v23 = vld [vmem:[#allocation5 + $0x64] ss:$16 sps:$4 sm:$0xff]  }
  0x40   :  { %v3040_v24 = vld [vmem:[#allocation5 + $0x2c] ss:$16 sps:$4 sm:$0xff]   ;;  %v3038_v25 = vld [vmem:[#allocation5 + $0x28] ss:$16 sps:$4 sm:$0xff]   ;;  %v3053_v26 = vld [vmem:[#allocation5 + $0x60] ss:$16 sps:$4 sm:$0xff]  }
  0x41   :  { %v3054_v27 = vld [vmem:[#allocation5 + $0x84] ss:$16 sps:$4 sm:$0xff]   ;;  %v3046_v28 = vld [vmem:[#allocation5 + $0x4c] ss:$16 sps:$4 sm:$0xff]   ;;  %v3059_v29 = vld [vmem:[#allocation5 + $0x80] ss:$16 sps:$4 sm:$0xff]  }
  0x42   :  { %147 = vmatpush1.bf16.msra.mxu0 %v3026_v11  ;;  %596 = vmatpush1.bf16.msra.mxu1 %v3041_v16  ;;  %v3044_v30 = vld [vmem:[#allocation5 + $0x48] ss:$16 sps:$4 sm:$0xff]   ;;  %v3060_v31 = vld [vmem:[#allocation5 + $0xa4] ss:$16 sps:$4 sm:$0xff]   ;;  %v3052_v32 = vld [vmem:[#allocation5 + $0x6c] ss:$16 sps:$4 sm:$0xff]  }
  0x43   :  { %148 = vmatprep.subr.bf16.mxu0 %v140_v13  ;;  %597 = vmatprep.subr.bf16.mxu1 %v3042_v18  ;;  %v3050_v33 = vld [vmem:[#allocation5 + $0x68] ss:$16 sps:$4 sm:$0xff]   ;;  %v3065_v34 = vld [vmem:[#allocation5 + $0xa0] ss:$16 sps:$4 sm:$0xff]   ;;  %v3066_v35 = vld [vmem:[#allocation5 + $0xc4] ss:$16 sps:$4 sm:$0xff]  }
  0x44   :  { %v3058_v36 = vld [vmem:[#allocation5 + $0x8c] ss:$16 sps:$4 sm:$0xff]   ;;  %v3071_v37 = vld [vmem:[#allocation5 + $0xc0] ss:$16 sps:$4 sm:$0xff]   ;;  %v3056_v38 = vld [vmem:[#allocation5 + $0x88] ss:$16 sps:$4 sm:$0xff]  }
  0x45   :  { %v3072_v39 = vld [vmem:[#allocation5 + $0xe4] ss:$16 sps:$4 sm:$0xff]   ;;  %v3064_v40 = vld [vmem:[#allocation5 + $0xac] ss:$16 sps:$4 sm:$0xff]   ;;  %v3062_v41 = vld [vmem:[#allocation5 + $0xa8] ss:$16 sps:$4 sm:$0xff]  }
  0x46   :  { %149 = vmatpush1.bf16.msra.mxu0 %v137_v17  ;;  %598 = vmatpush1.bf16.msra.mxu1 %v3047_v21  ;;  %v3077_v42 = vld [vmem:[#allocation5 + $0xe0] ss:$16 sps:$4 sm:$0xff]   ;;  %v3078_v43 = vld [vmem:[#allocation5 + $0x104] ss:$16 sps:$4 sm:$0xff]   ;;  %v3070_v44 = vld [vmem:[#allocation5 + $0xcc] ss:$16 sps:$4 sm:$0xff]  }
  0x47   :  { %634 = vmatprep.subr.bf16.mxu0 %v3034_v19  ;;  %599 = vmatprep.subr.bf16.mxu1 %v3048_v23  ;;  %v3083_v45 = vld [vmem:[#allocation5 + $0x100] ss:$16 sps:$4 sm:$0xff]   ;;  %v3068_v46 = vld [vmem:[#allocation5 + $0xc8] ss:$16 sps:$4 sm:$0xff]   ;;  %v3084_v47 = vld [vmem:[#allocation5 + $0x124] ss:$16 sps:$4 sm:$0xff]   ;;  %v80_v23 = vlaneseq }
  0x48   :  { %v3076_v48 = vld [vmem:[#allocation5 + $0xec] ss:$16 sps:$4 sm:$0xff]   ;;  %v3074_v49 = vld [vmem:[#allocation5 + $0xe8] ss:$16 sps:$4 sm:$0xff]   ;;  %v3089_v51 = vld [vmem:[#allocation5 + $0x120] ss:$16 sps:$4 sm:$0xff]  }
  0x49   :  { %2661 = vmatmul.mubr.msk.bf16.vlgmr.msra.gmra.mrb[0].mxu0 %vm128_vm2, %v69_v20  ;;  %v3082_v50 = vld [vmem:[#allocation5 + $0x10c] ss:$16 sps:$4 sm:$0xff]   ;;  %v3090_v52 = vld [vmem:[#allocation5 + $0x144] ss:$16 sps:$4 sm:$0xff]   ;;  %v3095_v53 = vld [vmem:[#allocation5 + $0x140] ss:$16 sps:$4 sm:$0xff]  }
  0x4a   :  { %635 = vmatpush1.bf16.msra.mxu0 %v3032_v22  ;;  %600 = vmatpush1.bf16.msra.mxu1 %v3053_v26  ;;  %v3080_v54 = vld [vmem:[#allocation5 + $0x108] ss:$16 sps:$4 sm:$0xff]   ;;  %v3096_v55 = vld [vmem:[#allocation5 + $0x164] ss:$16 sps:$4 sm:$0xff]   ;;  %v3088_v56 = vld [vmem:[#allocation5 + $0x12c] ss:$16 sps:$4 sm:$0xff]  }
  0x4b   :  { %636 = vmatprep.subr.bf16.mxu0 %v3040_v24  ;;  %601 = vmatprep.subr.bf16.mxu1 %v3054_v27  ;;  %v3101_v57 = vld [vmem:[#allocation5 + $0x160] ss:$16 sps:$4 sm:$0xff]   ;;  %v3086_v58 = vld [vmem:[#allocation5 + $0x128] ss:$16 sps:$4 sm:$0xff]   ;;  %v3102_v59 = vld [vmem:[#allocation5 + $0x184] ss:$16 sps:$4 sm:$0xff]  }
  0x4c   :  { %v3094_v60 = vld [vmem:[#allocation5 + $0x14c] ss:$16 sps:$4 sm:$0xff]   ;;  %v3107_v61 = vld [vmem:[#allocation5 + $0x180] ss:$16 sps:$4 sm:$0xff]   ;;  %v3092_v62 = vld [vmem:[#allocation5 + $0x148] ss:$16 sps:$4 sm:$0xff]  }
  0x4d   :  { %v3108_v63 = vld [vmem:[#allocation5 + $0x1a4] ss:$16 sps:$4 sm:$0xff]   ;;  %v3100_v0 = vld [vmem:[#allocation5 + $0x16c] ss:$16 sps:$4 sm:$0xff]   ;;  %v3113_v1 = vld [vmem:[#allocation5 + $0x1a0] ss:$16 sps:$4 sm:$0xff]  }
  0x4e   :  { %637 = vmatpush1.bf16.msra.mxu0 %v3038_v25  ;;  %602 = vmatpush1.bf16.msra.mxu1 %v3059_v29  ;;  %v3098_v2 = vld [vmem:[#allocation5 + $0x168] ss:$16 sps:$4 sm:$0xff]   ;;  %v3106_v3 = vld [vmem:[#allocation5 + $0x18c] ss:$16 sps:$4 sm:$0xff]   ;;  %v3114_v7 = vld [vmem:[#allocation5 + $0x1c4] ss:$16 sps:$4 sm:$0xff]  }
  0x4f   :  { %638 = vmatprep.subr.bf16.mxu0 %v3046_v28  ;;  %603 = vmatprep.subr.bf16.mxu1 %v3060_v31  ;;  %v3104_v4 = vld [vmem:[#allocation5 + $0x188] ss:$16 sps:$4 sm:$0xff]   ;;  %v3112_v5 = vld [vmem:[#allocation5 + $0x1ac] ss:$16 sps:$4 sm:$0xff]   ;;  %v3119_v10 = vld [vmem:[#allocation5 + $0x1c0] ss:$16 sps:$4 sm:$0xff]  }
  0x50   :  { %v3110_v6 = vld [vmem:[#allocation5 + $0x1a8] ss:$16 sps:$4 sm:$0xff]   ;;  %v3118_v8 = vld [vmem:[#allocation5 + $0x1cc] ss:$16 sps:$4 sm:$0xff]   ;;  %v3120_v11 = vld [vmem:[#allocation5 + $0x1e4] ss:$16 sps:$4 sm:$0xff]  }
  0x51   :  { %v3116_v9 = vld [vmem:[#allocation5 + $0x1c8] ss:$16 sps:$4 sm:$0xff]   ;;  %v3124_v12 = vld [vmem:[#allocation5 + $0x1ec] ss:$16 sps:$4 sm:$0xff]   ;;  %v3125_v14 = vld [vmem:[#allocation5 + $0x1e0] ss:$16 sps:$4 sm:$0xff]  }
  0x52   :  { %639 = vmatpush1.bf16.msra.mxu0 %v3044_v30  ;;  %604 = vmatpush1.bf16.msra.mxu1 %v3065_v34  ;;  %v3122_v13 = vld [vmem:[#allocation5 + $0x1e8] ss:$16 sps:$4 sm:$0xff]   ;;  %v683_v15 = vld [vmem:[#allocation7] sm:$0xff]  ;;  %v3343_v24 = vshrl.u32 %v80_v23, 7 }
  0x53   :  { %640 = vmatprep.subr.bf16.mxu0 %v3052_v32  ;;  %605 = vmatprep.subr.bf16.mxu1 %v3066_v35  ;;  %v687_v16 = vld [vmem:[#allocation7 + $0x20] sm:$0xff]  ;;  %v684_v17 = vld [vmem:[#allocation7 + $0x8] sm:$0xff]  ;;  %v78_v26 = vld [vmem:[%s3427_s2] sm:$0x3] }
  0x54   :  { %v2726_v18 = vcombine.low %v683_v15, %v687_v16  ;;  %v2727_v19 = vcombine.high %v683_v15, %v687_v16  ;;  %v688_v20 = vld [vmem:[#allocation7 + $0x28] sm:$0xff]  ;;  %v3346_v25 = vsub.s32 0, %v3343_v24  ;;  %v3352_v27 = vsub.s32 1, %v3343_v24  ;;  %v735_v15 = vld [vmem:[#allocation7 + $0x1a0] sm:$0xff] }
  0x55   :  { %v2728_v21 = vcombine.low %v684_v17, %v688_v20  ;;  %v2729_v22 = vcombine.high %v684_v17, %v688_v20  ;;  %v732_v16 = vld [vmem:[#allocation7 + $0x188] sm:$0xff]  ;;  %v743_v23 = vld [vmem:[#allocation7 + $0x1e0] sm:$0xff] }
  0x56   :  { %641 = vmatpush1.bf16.msra.mxu0 %v3050_v33  ;;  %606 = vmatpush1.bf16.msra.mxu1 %v3071_v37  ;;  %v83_v28 = vrot.slane %v78_v26, %v3346_v25  ;;  %v87_v29 = vrot.slane %v78_v26, %v3352_v27  ;;  %v691_v37 = vld [vmem:[#allocation7 + $0x40] sm:$0xff]  ;;  %v736_v17 = vld [vmem:[#allocation7 + $0x1a8] sm:$0xff] }
  0x57   :  { %642 = vmatprep.subr.bf16.mxu0 %v3058_v36  ;;  %607 = vmatprep.subr.bf16.mxu1 %v3072_v39  ;;  %v695_v39 = vld [vmem:[#allocation7 + $0x60] sm:$0xff]  ;;  %v740_v26 = vld [vmem:[#allocation7 + $0x1c8] sm:$0xff] }
  0x5a   :  { %643 = vmatpush1.bf16.msra.mxu0 %v3056_v38  ;;  %608 = vmatpush1.bf16.msra.mxu1 %v3077_v42 }
  0x5b   :  { %644 = vmatprep.subr.bf16.mxu0 %v3064_v40  ;;  %609 = vmatprep.subr.bf16.mxu1 %v3078_v43  ;;  %v692_v40 = vld [vmem:[#allocation7 + $0x48] sm:$0xff] }
  0x5e   :  { %645 = vmatpush1.bf16.msra.mxu0 %v3062_v41  ;;  %610 = vmatpush1.bf16.msra.mxu1 %v3083_v45  ;;  %v696_v41 = vld [vmem:[#allocation7 + $0x68] sm:$0xff] }
  0x5f   :  { %646 = vmatprep.subr.bf16.mxu0 %v3070_v44  ;;  %611 = vmatprep.subr.bf16.mxu1 %v3084_v47  ;;  %v2735_v44 = vcombine.high %v691_v37, %v695_v39  ;;  %v2737_v45 = vcombine.high %v692_v40, %v696_v41  ;;  %v703_v47 = vld [vmem:[#allocation7 + $0xa0] sm:$0xff] }
  0x62   :  { %647 = vmatpush1.bf16.msra.mxu0 %v3068_v46  ;;  %612 = vmatpush1.bf16.msra.mxu1 %v3089_v51  ;;  %v699_v46 = vld [vmem:[#allocation7 + $0x80] sm:$0xff]  ;;  %v2736_v51 = vcombine.low %v692_v40, %v696_v41 }
  0x63   :  { %648 = vmatprep.subr.bf16.mxu0 %v3076_v48  ;;  %613 = vmatprep.subr.bf16.mxu1 %v3090_v52  ;;  %v700_v48 = vld [vmem:[#allocation7 + $0x88] sm:$0xff]  ;;  %v2743_v52 = vcombine.high %v699_v46, %v703_v47  ;;  %v755_v41 = vld [vmem:[#allocation7 + $0x240] sm:$0xff] }
  0x66   :  { %649 = vmatpush1.bf16.msra.mxu0 %v3074_v49  ;;  %614 = vmatpush1.bf16.msra.mxu1 %v3095_v53  ;;  %v704_v49 = vld [vmem:[#allocation7 + $0xa8] sm:$0xff] }
  0x67   :  { %650 = vmatprep.subr.bf16.mxu0 %v3082_v50  ;;  %615 = vmatprep.subr.bf16.mxu1 %v3096_v55  ;;  %v2734_v50 = vcombine.low %v691_v37, %v695_v39  ;;  %v2745_v53 = vcombine.high %v700_v48, %v704_v49  ;;  %v711_v55 = vld [vmem:[#allocation7 + $0xe0] sm:$0xff] }
  0x6a   :  { %651 = vmatpush1.bf16.msra.mxu0 %v3080_v54  ;;  %616 = vmatpush1.bf16.msra.mxu1 %v3101_v57  ;;  %v707_v54 = vld [vmem:[#allocation7 + $0xc0] sm:$0xff]  ;;  %v712_v57 = vld [vmem:[#allocation7 + $0xe8] sm:$0xff] }
  0x6b   :  { %652 = vmatprep.subr.bf16.mxu0 %v3088_v56  ;;  %617 = vmatprep.subr.bf16.mxu1 %v3102_v59  ;;  %v708_v56 = vld [vmem:[#allocation7 + $0xc8] sm:$0xff]  ;;  %v2744_v59 = vcombine.low %v700_v48, %v704_v49  ;;  %v763_v49 = vld [vmem:[#allocation7 + $0x280] sm:$0xff] }
  0x6e   :  { %653 = vmatpush1.bf16.msra.mxu0 %v3086_v58  ;;  %618 = vmatpush1.bf16.msra.mxu1 %v3107_v61  ;;  %v2742_v58 = vcombine.low %v699_v46, %v703_v47  ;;  %v2753_v61 = vcombine.high %v708_v56, %v712_v57 }
  0x6f   :  { %654 = vmatprep.subr.bf16.mxu0 %v3094_v60  ;;  %619 = vmatprep.subr.bf16.mxu1 %v3108_v63  ;;  %v2751_v60 = vcombine.high %v707_v54, %v711_v55  ;;  %v719_v63 = vld [vmem:[#allocation7 + $0x120] sm:$0xff] }
  0x72   :  { %655 = vmatpush1.bf16.msra.mxu0 %v3092_v62  ;;  %620 = vmatpush1.bf16.msra.mxu1 %v3113_v1  ;;  %v715_v62 = vld [vmem:[#allocation7 + $0x100] sm:$0xff]  ;;  %v720_v1 = vld [vmem:[#allocation7 + $0x128] sm:$0xff] }
  0x73   :  { %656 = vmatprep.subr.bf16.mxu0 %v3100_v0  ;;  %621 = vmatprep.subr.bf16.mxu1 %v3114_v7  ;;  %v716_v0 = vld [vmem:[#allocation7 + $0x108] sm:$0xff]  ;;  %v727_v7 = vld [vmem:[#allocation7 + $0x160] sm:$0xff] }
  0x76   :  { %657 = vmatpush1.bf16.msra.mxu0 %v3098_v2  ;;  %622 = vmatpush1.bf16.msra.mxu1 %v3119_v10  ;;  %v2750_v2 = vcombine.low %v707_v54, %v711_v55  ;;  %v2758_v10 = vcombine.low %v715_v62, %v719_v63 }
  0x77   :  { %658 = vmatprep.subr.bf16.mxu0 %v3106_v3  ;;  %623 = vmatprep.subr.bf16.mxu1 %v3120_v11  ;;  %v2752_v3 = vcombine.low %v708_v56, %v712_v57  ;;  %v2760_v11 = vcombine.low %v716_v0, %v720_v1  ;;  %v771_v57 = vld [vmem:[#allocation7 + $0x2c0] sm:$0xff] }
  0x7a   :  { %659 = vmatpush1.bf16.msra.mxu0 %v3104_v4  ;;  %624 = vmatpush1.bf16.msra.mxu1 %v3125_v14  ;;  %v2759_v4 = vcombine.high %v715_v62, %v719_v63  ;;  %v731_v14 = vld [vmem:[#allocation7 + $0x180] sm:$0xff] }
  0x7b   :  { %660 = vmatprep.subr.bf16.mxu0 %v3112_v5  ;;  %2261 = vmatprep.subr.bf16.mxu1 %v2727_v19  ;;  %v2761_v5 = vcombine.high %v716_v0, %v720_v1  ;;  %v2775_v20 = vcombine.high %v731_v14, %v735_v15  ;;  %v779_v1 = vld [vmem:[#allocation7 + $0x300] sm:$0xff] }
  0x7e   :  { %661 = vmatpush1.bf16.msra.mxu0 %v3110_v6  ;;  %v723_v6 = vld [vmem:[#allocation7 + $0x140] sm:$0xff] }
  0x7f   :  { %662 = vmatprep.subr.bf16.mxu0 %v3118_v8  ;;  %v724_v8 = vld [vmem:[#allocation7 + $0x148] sm:$0xff] }
  0x82   :  { %663 = vmatpush1.bf16.msra.mxu0 %v3116_v9  ;;  %v728_v9 = vld [vmem:[#allocation7 + $0x168] sm:$0xff] }
  0x83   :  { %664 = vmatprep.subr.bf16.mxu0 %v3124_v12  ;;  %v2767_v12 = vcombine.high %v723_v6, %v727_v7  ;;  %v2768_v19 = vcombine.low %v724_v8, %v728_v9 }
  0x86   :  { %665 = vmatpush1.bf16.msra.mxu0 %v3122_v13  ;;  %v2769_v13 = vcombine.high %v724_v8, %v728_v9  ;;  %v787_v9 = vld [vmem:[#allocation7 + $0x340] sm:$0xff] }
  0x87   :  { %2343 = vmatprep.subr.bf16.mxu0 %v2729_v22  ;;  %v739_v22 = vld [vmem:[#allocation7 + $0x1c0] sm:$0xff] }
  0x88   :  { %v2782_v37 = vcombine.low %v739_v22, %v743_v23 }
 0x11c   :  { %v176_v30 = vpop.f32.mrb[0].mxu0 }
 0x11d   :  { %v177_v31 = vadd.f32 %v176_v30, %v83_v28  ;;  %v178_v32 = vpop.f32.mrb[1].mxu0  ;;  %v744_v28 = vld [vmem:[#allocation7 + $0x1e8] sm:$0xff]  ;;  %v2776_v30 = vcombine.low %v732_v16, %v736_v17 }
 0x11e   :  { %v179_v33 = vadd.f32 %v178_v32, %v87_v29  ;;  %v180_v34 = vpop.f32.mrb[2].mxu0  ;;  %v2774_v29 = vcombine.low %v731_v14, %v735_v15  ;;  %v2785_v32 = vcombine.high %v740_v26, %v744_v28 }
 0x11f   :  { %v183_v35 = vmax.f32 %v177_v31, 0.0  ;;  %v181_v36 = vpop.f32.mrb[3].mxu0  ;;  %v2783_v31 = vcombine.high %v739_v22, %v743_v23  ;;  %v751_v34 = vld [vmem:[#allocation7 + $0x220] sm:$0xff]  ;;  %v800_v23 = vld [vmem:[#allocation7 + $0x3a8] sm:$0xff] }
 0x120   :  { %v184_v38 = vmax.f32 %v179_v33, 0.0  ;;  %v747_v33 = vld [vmem:[#allocation7 + $0x200] sm:$0xff]  ;;  %v752_v36 = vld [vmem:[#allocation7 + $0x228] sm:$0xff] }
 0x121   :  { %v185_v43 = vpack.c.bf16 %v183_v35, %v183_v35  ;;  %v748_v35 = vld [vmem:[#allocation7 + $0x208] sm:$0xff]  ;;  %v2791_v39 = vcombine.high %v747_v33, %v751_v34 }
 0x122   :  { %v186_v42 = vpack.c.bf16 %v184_v38, %v184_v38  ;;  %v2784_v38 = vcombine.low %v740_v26, %v744_v28  ;;  %v2793_v40 = vcombine.high %v748_v35, %v752_v36  ;;  %v2792_v46 = vcombine.low %v748_v35, %v752_v36 }
 0x124   :  { %625 = vmatprep.mubr.bf16.mxu1 %v186_v42  ;;  %666 = vmatprep.mubr.bf16.mxu0 %v186_v42  ;;  %v759_v42 = vld [vmem:[#allocation7 + $0x260] sm:$0xff] }
 0x125   :  { %626 = vmatmul.mubr.bf16.vlgmr.msra.gmra.mrb[0].mxu1 %v185_v43  ;;  %667 = vmatmul.mubr.bf16.vlgmr.msra.gmra.mrb[4].mxu0 %v185_v43  ;;  %v756_v43 = vld [vmem:[#allocation7 + $0x248] sm:$0xff]  ;;  %v2799_v47 = vcombine.high %v755_v41, %v759_v42 }
 0x126   :  { %2262 = vmatpush1.bf16.msra.mxu1 %v2726_v18  ;;  %2344 = vmatpush1.bf16.msra.mxu0 %v2728_v21  ;;  %v2766_v18 = vcombine.low %v723_v6, %v727_v7  ;;  %v2777_v21 = vcombine.high %v732_v16, %v736_v17 }
 0x127   :  { %2263 = vmatprep.subr.bf16.mxu1 %v2735_v44  ;;  %2345 = vmatprep.subr.bf16.mxu0 %v2737_v45  ;;  %v760_v44 = vld [vmem:[#allocation7 + $0x268] sm:$0xff]  ;;  %v2790_v45 = vcombine.low %v747_v33, %v751_v34 }
 0x128   :  { %v2801_v48 = vcombine.high %v756_v43, %v760_v44  ;;  %v2800_v54 = vcombine.low %v756_v43, %v760_v44  ;;  %v808_v34 = vld [vmem:[#allocation7 + $0x3e8] sm:$0xff] }
 0x12a   :  { %2264 = vmatpush1.bf16.msra.mxu1 %v2734_v50  ;;  %2346 = vmatpush1.bf16.msra.mxu0 %v2736_v51  ;;  %v767_v50 = vld [vmem:[#allocation7 + $0x2a0] sm:$0xff]  ;;  %v764_v51 = vld [vmem:[#allocation7 + $0x288] sm:$0xff] }
 0x12b   :  { %2265 = vmatprep.subr.bf16.mxu1 %v2743_v52  ;;  %2347 = vmatprep.subr.bf16.mxu0 %v2745_v53  ;;  %v768_v52 = vld [vmem:[#allocation7 + $0x2a8] sm:$0xff]  ;;  %v2798_v53 = vcombine.low %v755_v41, %v759_v42  ;;  %v2807_v55 = vcombine.high %v763_v49, %v767_v50 }
 0x12c   :  { %v2809_v56 = vcombine.high %v764_v51, %v768_v52  ;;  %v2808_v62 = vcombine.low %v764_v51, %v768_v52  ;;  %v816_v42 = vld [vmem:[#allocation7 + $0x428] sm:$0xff] }
 0x12e   :  { %2266 = vmatpush1.bf16.msra.mxu1 %v2742_v58  ;;  %2348 = vmatpush1.bf16.msra.mxu0 %v2744_v59  ;;  %v775_v58 = vld [vmem:[#allocation7 + $0x2e0] sm:$0xff]  ;;  %v772_v59 = vld [vmem:[#allocation7 + $0x2c8] sm:$0xff] }
 0x12f   :  { %2267 = vmatprep.subr.bf16.mxu1 %v2751_v60  ;;  %2349 = vmatprep.subr.bf16.mxu0 %v2753_v61  ;;  %v776_v60 = vld [vmem:[#allocation7 + $0x2e8] sm:$0xff]  ;;  %v2806_v61 = vcombine.low %v763_v49, %v767_v50  ;;  %v2815_v63 = vcombine.high %v771_v57, %v775_v58 }
 0x130   :  { %v2817_v0 = vcombine.high %v772_v59, %v776_v60  ;;  %v2816_v6 = vcombine.low %v772_v59, %v776_v60 }
 0x132   :  { %2268 = vmatpush1.bf16.msra.mxu1 %v2750_v2  ;;  %2350 = vmatpush1.bf16.msra.mxu0 %v2752_v3  ;;  %v783_v2 = vld [vmem:[#allocation7 + $0x320] sm:$0xff]  ;;  %v780_v3 = vld [vmem:[#allocation7 + $0x308] sm:$0xff] }
 0x133   :  { %2269 = vmatprep.subr.bf16.mxu1 %v2759_v4  ;;  %2351 = vmatprep.subr.bf16.mxu0 %v2761_v5  ;;  %v784_v4 = vld [vmem:[#allocation7 + $0x328] sm:$0xff]  ;;  %v2814_v5 = vcombine.low %v771_v57, %v775_v58  ;;  %v2823_v7 = vcombine.high %v779_v1, %v783_v2 }
 0x134   :  { %v2825_v8 = vcombine.high %v780_v3, %v784_v4  ;;  %v2824_v14 = vcombine.low %v780_v3, %v784_v4  ;;  %v820_v3 = vld [vmem:[#allocation7 + $0x448] sm:$0xff] }
 0x135   :  { %v824_v4 = vld [vmem:[#allocation7 + $0x468] sm:$0xff] }
 0x136   :  { %2270 = vmatpush1.bf16.msra.mxu1 %v2758_v10  ;;  %2352 = vmatpush1.bf16.msra.mxu0 %v2760_v11  ;;  %v791_v10 = vld [vmem:[#allocation7 + $0x360] sm:$0xff]  ;;  %v788_v11 = vld [vmem:[#allocation7 + $0x348] sm:$0xff] }
 0x137   :  { %2271 = vmatprep.subr.bf16.mxu1 %v2767_v12  ;;  %2353 = vmatprep.subr.bf16.mxu0 %v2769_v13  ;;  %v792_v12 = vld [vmem:[#allocation7 + $0x368] sm:$0xff]  ;;  %v2822_v13 = vcombine.low %v779_v1, %v783_v2  ;;  %v2831_v15 = vcombine.high %v787_v9, %v791_v10  ;;  %v2830_v17 = vcombine.low %v787_v9, %v791_v10  ;;  %v823_v2 = vld [vmem:[#allocation7 + $0x460] sm:$0xff] }
 0x138   :  { %v2833_v16 = vcombine.high %v788_v11, %v792_v12  ;;  %v2865_v9 = vcombine.high %v820_v3, %v824_v4  ;;  %v831_v10 = vld [vmem:[#allocation7 + $0x4a0] sm:$0xff] }
 0x13a   :  { %2272 = vmatpush1.bf16.msra.mxu1 %v2766_v18  ;;  %2354 = vmatpush1.bf16.msra.mxu0 %v2768_v19  ;;  %v2832_v18 = vcombine.low %v788_v11, %v792_v12  ;;  %v795_v19 = vld [vmem:[#allocation7 + $0x380] sm:$0xff]  ;;  %v828_v11 = vld [vmem:[#allocation7 + $0x488] sm:$0xff] }
 0x13b   :  { %2273 = vmatprep.subr.bf16.mxu1 %v2775_v20  ;;  %2355 = vmatprep.subr.bf16.mxu0 %v2777_v21  ;;  %v799_v20 = vld [vmem:[#allocation7 + $0x3a0] sm:$0xff]  ;;  %v796_v21 = vld [vmem:[#allocation7 + $0x388] sm:$0xff] }
 0x13c   :  { %v2839_v22 = vcombine.high %v795_v19, %v799_v20  ;;  %v2838_v26 = vcombine.low %v795_v19, %v799_v20  ;;  %v2840_v28 = vcombine.low %v796_v21, %v800_v23  ;;  %v832_v12 = vld [vmem:[#allocation7 + $0x4a8] sm:$0xff]  ;;  %v839_v19 = vld [vmem:[#allocation7 + $0x4e0] sm:$0xff] }
 0x13d   :  { %v836_v20 = vld [vmem:[#allocation7 + $0x4c8] sm:$0xff] }
 0x13e   :  { %2274 = vmatpush1.bf16.msra.mxu1 %v2774_v29  ;;  %2356 = vmatpush1.bf16.msra.mxu0 %v2776_v30  ;;  %v2841_v29 = vcombine.high %v796_v21, %v800_v23  ;;  %v803_v30 = vld [vmem:[#allocation7 + $0x3c0] sm:$0xff]  ;;  %v840_v21 = vld [vmem:[#allocation7 + $0x4e8] sm:$0xff]  ;;  %v2872_v23 = vcombine.low %v828_v11, %v832_v12 }
 0x13f   :  { %2275 = vmatprep.subr.bf16.mxu1 %v2783_v31  ;;  %2357 = vmatprep.subr.bf16.mxu0 %v2785_v32  ;;  %v807_v31 = vld [vmem:[#allocation7 + $0x3e0] sm:$0xff]  ;;  %v804_v32 = vld [vmem:[#allocation7 + $0x3c8] sm:$0xff] }
 0x140   :  { %v2847_v33 = vcombine.high %v803_v30, %v807_v31  ;;  %v2846_v35 = vcombine.low %v803_v30, %v807_v31  ;;  %v2848_v36 = vcombine.low %v804_v32, %v808_v34  ;;  %v847_v30 = vld [vmem:[#allocation7 + $0x520] sm:$0xff]  ;;  %v844_v31 = vld [vmem:[#allocation7 + $0x508] sm:$0xff] }
 0x142   :  { %2276 = vmatpush1.bf16.msra.mxu1 %v2782_v37  ;;  %2358 = vmatpush1.bf16.msra.mxu0 %v2784_v38  ;;  %v2849_v37 = vcombine.high %v804_v32, %v808_v34  ;;  %v811_v38 = vld [vmem:[#allocation7 + $0x400] sm:$0xff]  ;;  %v848_v32 = vld [vmem:[#allocation7 + $0x528] sm:$0xff]  ;;  %v2880_v34 = vcombine.low %v836_v20, %v840_v21 }
 0x143   :  { %2277 = vmatprep.subr.bf16.mxu1 %v2791_v39  ;;  %2359 = vmatprep.subr.bf16.mxu0 %v2793_v40  ;;  %v815_v39 = vld [vmem:[#allocation7 + $0x420] sm:$0xff]  ;;  %v812_v40 = vld [vmem:[#allocation7 + $0x408] sm:$0xff] }
 0x144   :  { %v2855_v41 = vcombine.high %v811_v38, %v815_v39  ;;  %v2854_v43 = vcombine.low %v811_v38, %v815_v39  ;;  %v2856_v44 = vcombine.low %v812_v40, %v816_v42  ;;  %v855_v38 = vld [vmem:[#allocation7 + $0x560] sm:$0xff]  ;;  %v852_v39 = vld [vmem:[#allocation7 + $0x548] sm:$0xff] }
 0x146   :  { %2278 = vmatpush1.bf16.msra.mxu1 %v2790_v45  ;;  %2360 = vmatpush1.bf16.msra.mxu0 %v2792_v46  ;;  %v2857_v45 = vcombine.high %v812_v40, %v816_v42  ;;  %v3359_v46 = vld [vmem:[%s3429_s4] sm:$0xf]  ;;  %v856_v40 = vld [vmem:[#allocation7 + $0x568] sm:$0xff]  ;;  %v2888_v42 = vcombine.low %v844_v31, %v848_v32 }
 0x147   :  { %2279 = vmatprep.subr.bf16.mxu1 %v2799_v47  ;;  %2361 = vmatprep.subr.bf16.mxu0 %v2801_v48  ;;  %v267_v47 = vsub.s32 3, %v3343_v24  ;;  %v256_v48 = vrot.slane %v3359_v46, %v3346_v25  ;;  %v260_v49 = vrot.slane %v3359_v46, %v3352_v27 }
 0x149   :  { %v268_v50 = vrot.slane %v3359_v46, %v267_v47 }
 0x14a   :  { %2280 = vmatpush1.bf16.msra.mxu1 %v2798_v53  ;;  %2362 = vmatpush1.bf16.msra.mxu0 %v2800_v54 }
 0x14b   :  { %2281 = vmatprep.subr.bf16.mxu1 %v2807_v55  ;;  %2363 = vmatprep.subr.bf16.mxu0 %v2809_v56 }
 0x14e   :  { %2282 = vmatpush1.bf16.msra.mxu1 %v2806_v61  ;;  %2364 = vmatpush1.bf16.msra.mxu0 %v2808_v62 }
 0x14f   :  { %2283 = vmatprep.subr.bf16.mxu1 %v2815_v63  ;;  %2365 = vmatprep.subr.bf16.mxu0 %v2817_v0  ;;  %v819_v0 = vld [vmem:[#allocation7 + $0x440] sm:$0xff] }
 0x152   :  { %2284 = vmatpush1.bf16.msra.mxu1 %v2814_v5  ;;  %2366 = vmatpush1.bf16.msra.mxu0 %v2816_v6 }
 0x153   :  { %2285 = vmatprep.subr.bf16.mxu1 %v2823_v7  ;;  %2367 = vmatprep.subr.bf16.mxu0 %v2825_v8  ;;  %v827_v7 = vld [vmem:[#allocation7 + $0x480] sm:$0xff]  ;;  %v2863_v8 = vcombine.high %v819_v0, %v823_v2 }
 0x156   :  { %2286 = vmatpush1.bf16.msra.mxu1 %v2822_v13  ;;  %2368 = vmatpush1.bf16.msra.mxu0 %v2824_v14  ;;  %v2862_v14 = vcombine.low %v819_v0, %v823_v2  ;;  %v875_v0 = vld [vmem:[#allocation7 + $0x600] sm:$0xff]  ;;  %v876_v2 = vld [vmem:[#allocation7 + $0x608] sm:$0xff] }
 0x157   :  { %2287 = vmatprep.subr.bf16.mxu1 %v2831_v15  ;;  %2369 = vmatprep.subr.bf16.mxu0 %v2833_v16  ;;  %v2864_v15 = vcombine.low %v820_v3, %v824_v4  ;;  %v2871_v16 = vcombine.high %v827_v7, %v831_v10  ;;  %v880_v3 = vld [vmem:[#allocation7 + $0x628] sm:$0xff] }
 0x15a   :  { %2288 = vmatpush1.bf16.msra.mxu1 %v2830_v17  ;;  %2370 = vmatpush1.bf16.msra.mxu0 %v2832_v18  ;;  %v2873_v17 = vcombine.high %v828_v11, %v832_v12  ;;  %v835_v18 = vld [vmem:[#allocation7 + $0x4c0] sm:$0xff]  ;;  %v884_v12 = vld [vmem:[#allocation7 + $0x648] sm:$0xff] }
 0x15b   :  { %2289 = vmatprep.subr.bf16.mxu1 %v2839_v22  ;;  %2371 = vmatprep.subr.bf16.mxu0 %v2841_v29  ;;  %v2870_v22 = vcombine.low %v827_v7, %v831_v10  ;;  %v843_v29 = vld [vmem:[#allocation7 + $0x500] sm:$0xff] }
 0x15c   :  { %v883_v10 = vld [vmem:[#allocation7 + $0x640] sm:$0xff] }
 0x15d   :  { %v887_v11 = vld [vmem:[#allocation7 + $0x660] sm:$0xff] }
 0x15e   :  { %2290 = vmatpush1.bf16.msra.mxu1 %v2838_v26  ;;  %2372 = vmatpush1.bf16.msra.mxu0 %v2840_v28  ;;  %v2879_v26 = vcombine.high %v835_v18, %v839_v19  ;;  %v2881_v28 = vcombine.high %v836_v20, %v840_v21  ;;  %v895_v20 = vld [vmem:[#allocation7 + $0x6a0] sm:$0xff]  ;;  %v892_v21 = vld [vmem:[#allocation7 + $0x688] sm:$0xff] }
 0x15f   :  { %2291 = vmatprep.subr.bf16.mxu1 %v2847_v33  ;;  %2373 = vmatprep.subr.bf16.mxu0 %v2849_v37  ;;  %v2878_v33 = vcombine.low %v835_v18, %v839_v19  ;;  %v851_v37 = vld [vmem:[#allocation7 + $0x540] sm:$0xff] }
 0x160   :  { %v891_v19 = vld [vmem:[#allocation7 + $0x680] sm:$0xff] }
 0x162   :  { %2292 = vmatpush1.bf16.msra.mxu1 %v2846_v35  ;;  %2374 = vmatpush1.bf16.msra.mxu0 %v2848_v36  ;;  %v2887_v35 = vcombine.high %v843_v29, %v847_v30  ;;  %v2889_v36 = vcombine.high %v844_v31, %v848_v32  ;;  %v903_v31 = vld [vmem:[#allocation7 + $0x6e0] sm:$0xff]  ;;  %v900_v32 = vld [vmem:[#allocation7 + $0x6c8] sm:$0xff] }
 0x163   :  { %2302 = vmatprep.subr.bf16.mxu1 %v2855_v41  ;;  %2384 = vmatprep.subr.bf16.mxu0 %v2857_v45  ;;  %v2886_v41 = vcombine.low %v843_v29, %v847_v30  ;;  %v859_v45 = vld [vmem:[#allocation7 + $0x580] sm:$0xff] }
 0x164   :  { %v899_v30 = vld [vmem:[#allocation7 + $0x6c0] sm:$0xff] }
 0x1f8   :  { %v627_v51 = vpop.f32.mrb[0].mxu1  ;;  %v3369_v52 = vpop.f32.mrb[4].mxu0 }
 0x1f9   :  { %v628_v53 = vadd.f32 %v627_v51, %v256_v48  ;;  %v629_v54 = vpop.f32.mrb[1].mxu1  ;;  %v670_v55 = vpop.f32.mrb[5].mxu0  ;;  %v863_v48 = vld [vmem:[#allocation7 + $0x5a0] sm:$0xff]  ;;  %v2894_v51 = vcombine.low %v851_v37, %v855_v38 }
 0x1fa   :  { %v630_v56 = vadd.f32 %v629_v54, %v260_v49  ;;  %v671_v57 = vadd.f32 %v670_v55, %v268_v50  ;;  %v631_v58 = vpop.f32.mrb[2].mxu1  ;;  %v672_v59 = vpop.f32.mrb[6].mxu0  ;;  %v860_v49 = vld [vmem:[#allocation7 + $0x588] sm:$0xff]  ;;  %v2903_v54 = vcombine.high %v859_v45, %v863_v48 }
 0x1fb   :  { %v675_v60 = vmax.f32 %v628_v53, 0.0  ;;  %v632_v61 = vpop.f32.mrb[3].mxu1  ;;  %v673_v62 = vpop.f32.mrb[7].mxu0  ;;  %v864_v50 = vld [vmem:[#allocation7 + $0x5a8] sm:$0xff]  ;;  %v2896_v53 = vcombine.low %v852_v39, %v856_v40 }
 0x1fc   :  { %v676_v63 = vmax.f32 %v630_v56, 0.0  ;;  %v678_v1 = vmax.f32 %v671_v57, 0.0  ;;  %v2905_v55 = vcombine.high %v860_v49, %v864_v50  ;;  %v867_v56 = vld [vmem:[#allocation7 + $0x5c0] sm:$0xff]  ;;  %v868_v58 = vld [vmem:[#allocation7 + $0x5c8] sm:$0xff]  ;;  %v2904_v61 = vcombine.low %v860_v49, %v864_v50 }
 0x1fd   :  { %v3373_v6 = vpack.c.bf16 %v675_v60, %v675_v60  ;;  %v871_v57 = vld [vmem:[#allocation7 + $0x5e0] sm:$0xff]  ;;  %v872_v59 = vld [vmem:[#allocation7 + $0x5e8] sm:$0xff]  ;;  %v2902_v60 = vcombine.low %v859_v45, %v863_v48 }
 0x1fe   :  { %v3371_v5 = vpack.c.bf16 %v676_v63, %v676_v63  ;;  %v3377_v13 = vpack.c.bf16 %v678_v1, %v678_v1  ;;  %v2911_v62 = vcombine.high %v867_v56, %v871_v57  ;;  %v2913_v63 = vcombine.high %v868_v58, %v872_v59  ;;  %v879_v1 = vld [vmem:[#allocation7 + $0x620] sm:$0xff]  ;;  %v916_v50 = vld [vmem:[#allocation7 + $0x748] sm:$0xff] }
 0x1ff   :  { %v2910_v4 = vcombine.low %v867_v56, %v871_v57  ;;  %v2912_v7 = vcombine.low %v868_v58, %v872_v59  ;;  %v915_v48 = vld [vmem:[#allocation7 + $0x740] sm:$0xff] }
 0x200   :  { %2293 = vmatprep.mubr.bf16.mxu1 %v3371_v5  ;;  %2375 = vmatprep.mubr.bf16.mxu0 %v3371_v5  ;;  %v919_v49 = vld [vmem:[#allocation7 + $0x760] sm:$0xff] }
 0x201   :  { %2294 = vmatmul.mubr.bf16.vlgmr.msra.gmra.mrb[4].mxu1 %v3373_v6  ;;  %2376 = vmatmul.mubr.bf16.vlgmr.msra.gmra.mrb[8].mxu0 %v3373_v6  ;;  %v2959_v56 = vcombine.high %v915_v48, %v919_v49  ;;  %v923_v58 = vld [vmem:[#allocation7 + $0x780] sm:$0xff] }
 0x202   :  { %2303 = vmatpush1.bf16.msra.mxu1 %v2854_v43  ;;  %2385 = vmatpush1.bf16.msra.mxu0 %v2856_v44  ;;  %v2895_v43 = vcombine.high %v851_v37, %v855_v38  ;;  %v2897_v44 = vcombine.high %v852_v39, %v856_v40  ;;  %v907_v38 = vld [vmem:[#allocation7 + $0x700] sm:$0xff]  ;;  %v908_v40 = vld [vmem:[#allocation7 + $0x708] sm:$0xff] }
 0x203   :  { %2334 = vmatprep.mubr.bf16.mxu1 %v3377_v13  ;;  %2416 = vmatprep.mubr.bf16.mxu0 %v3377_v13  ;;  %v911_v39 = vld [vmem:[#allocation7 + $0x720] sm:$0xff] }
 0x204   :  { %2304 = vmatprep.subr.bf16.mxu1 %v2863_v8  ;;  %2386 = vmatprep.subr.bf16.mxu0 %v2865_v9  ;;  %v2919_v8 = vcombine.high %v875_v0, %v879_v1  ;;  %v2921_v9 = vcombine.high %v876_v2, %v880_v3  ;;  %v927_v59 = vld [vmem:[#allocation7 + $0x7a0] sm:$0xff] }
 0x206   :  { %2305 = vmatpush1.bf16.msra.mxu1 %v2862_v14  ;;  %2387 = vmatpush1.bf16.msra.mxu0 %v2864_v15  ;;  %v888_v14 = vld [vmem:[#allocation7 + $0x668] sm:$0xff]  ;;  %v2918_v15 = vcombine.low %v875_v0, %v879_v1  ;;  %v2967_v1 = vcombine.high %v923_v58, %v927_v59 }
 0x207   :  { %2306 = vmatprep.subr.bf16.mxu1 %v2871_v16  ;;  %2388 = vmatprep.subr.bf16.mxu0 %v2873_v17  ;;  %v2920_v16 = vcombine.low %v876_v2, %v880_v3  ;;  %v2927_v17 = vcombine.high %v883_v10, %v887_v11  ;;  %v2929_v18 = vcombine.high %v884_v12, %v888_v14  ;;  %v931_v3 = vld [vmem:[#allocation7 + $0x7c0] sm:$0xff] }
 0x20a   :  { %2307 = vmatpush1.bf16.msra.mxu1 %v2870_v22  ;;  %2389 = vmatpush1.bf16.msra.mxu0 %v2872_v23  ;;  %v896_v22 = vld [vmem:[#allocation7 + $0x6a8] sm:$0xff]  ;;  %v2926_v23 = vcombine.low %v883_v10, %v887_v11 }
 0x20b   :  { %2308 = vmatprep.subr.bf16.mxu1 %v2879_v26  ;;  %2390 = vmatprep.subr.bf16.mxu0 %v2881_v28  ;;  %v2928_v26 = vcombine.low %v884_v12, %v888_v14  ;;  %v2935_v28 = vcombine.high %v891_v19, %v895_v20  ;;  %v2937_v29 = vcombine.high %v892_v21, %v896_v22 }
 0x20e   :  { %2309 = vmatpush1.bf16.msra.mxu1 %v2878_v33  ;;  %2391 = vmatpush1.bf16.msra.mxu0 %v2880_v34  ;;  %v904_v33 = vld [vmem:[#allocation7 + $0x6e8] sm:$0xff]  ;;  %v2934_v34 = vcombine.low %v891_v19, %v895_v20 }
 0x20f   :  { %2310 = vmatprep.subr.bf16.mxu1 %v2887_v35  ;;  %2392 = vmatprep.subr.bf16.mxu0 %v2889_v36  ;;  %v2936_v35 = vcombine.low %v892_v21, %v896_v22  ;;  %v2943_v36 = vcombine.high %v899_v30, %v903_v31  ;;  %v2945_v37 = vcombine.high %v900_v32, %v904_v33 }
 0x212   :  { %2311 = vmatpush1.bf16.msra.mxu1 %v2886_v41  ;;  %2393 = vmatpush1.bf16.msra.mxu0 %v2888_v42  ;;  %v912_v41 = vld [vmem:[#allocation7 + $0x728] sm:$0xff]  ;;  %v2942_v42 = vcombine.low %v899_v30, %v903_v31 }
 0x213   :  { %2312 = vmatprep.subr.bf16.mxu1 %v2895_v43  ;;  %2394 = vmatprep.subr.bf16.mxu0 %v2897_v44  ;;  %v2944_v43 = vcombine.low %v900_v32, %v904_v33  ;;  %v2951_v44 = vcombine.high %v907_v38, %v911_v39  ;;  %v2953_v45 = vcombine.high %v908_v40, %v912_v41 }
 0x216   :  { %2313 = vmatpush1.bf16.msra.mxu1 %v2894_v51  ;;  %2395 = vmatpush1.bf16.msra.mxu0 %v2896_v53  ;;  %v920_v51 = vld [vmem:[#allocation7 + $0x768] sm:$0xff]  ;;  %v2950_v53 = vcombine.low %v907_v38, %v911_v39 }
 0x217   :  { %2314 = vmatprep.subr.bf16.mxu1 %v2903_v54  ;;  %2396 = vmatprep.subr.bf16.mxu0 %v2905_v55  ;;  %v2952_v54 = vcombine.low %v908_v40, %v912_v41  ;;  %v263_v55 = vsub.s32 2, %v3343_v24  ;;  %v2961_v57 = vcombine.high %v916_v50, %v920_v51 }
 0x219   :  { %v264_v0 = vrot.slane %v3359_v46, %v263_v55  ;;  %v689_v46 = vld [vmem:[#allocation7 + $0x30] sm:$0xff] }
 0x21a   :  { %2315 = vmatpush1.bf16.msra.mxu1 %v2902_v60  ;;  %2397 = vmatpush1.bf16.msra.mxu0 %v2904_v61  ;;  %v924_v60 = vld [vmem:[#allocation7 + $0x788] sm:$0xff] }
 0x21b   :  { %2316 = vmatprep.subr.bf16.mxu1 %v2911_v62  ;;  %2398 = vmatprep.subr.bf16.mxu0 %v2913_v63  ;;  %v928_v61 = vld [vmem:[#allocation7 + $0x7a8] sm:$0xff]  ;;  %v2958_v62 = vcombine.low %v915_v48, %v919_v49  ;;  %v2960_v63 = vcombine.low %v916_v50, %v920_v51  ;;  %v669_v11 = vadd.f32 %v3369_v52, %v264_v0  ;;  %v694_v52 = vld [vmem:[#allocation7 + $0x58] sm:$0xff] }
 0x21c   :  { %v2969_v2 = vcombine.high %v924_v60, %v928_v61  ;;  %v2968_v10 = vcombine.low %v924_v60, %v928_v61  ;;  %v725_v61 = vld [vmem:[#allocation7 + $0x150] sm:$0xff]  ;;  %v730_v0 = vld [vmem:[#allocation7 + $0x178] sm:$0xff] }
 0x21d   :  { %v677_v20 = vmax.f32 %v669_v11, 0.0 }
 0x21e   :  { %2317 = vmatpush1.bf16.msra.mxu1 %v2910_v4  ;;  %2399 = vmatpush1.bf16.msra.mxu0 %v2912_v7  ;;  %v935_v4 = vld [vmem:[#allocation7 + $0x7e0] sm:$0xff]  ;;  %v932_v7 = vld [vmem:[#allocation7 + $0x7c8] sm:$0xff] }
 0x21f   :  { %2318 = vmatprep.subr.bf16.mxu1 %v2919_v8  ;;  %2400 = vmatprep.subr.bf16.mxu0 %v2921_v9  ;;  %v936_v8 = vld [vmem:[#allocation7 + $0x7e8] sm:$0xff]  ;;  %v2966_v9 = vcombine.low %v923_v58, %v927_v59  ;;  %v2975_v12 = vcombine.high %v931_v3, %v935_v4  ;;  %v3388_v30 = vpack.c.bf16 %v677_v20, %v677_v20 }
 0x220   :  { %v2977_v14 = vcombine.high %v932_v7, %v936_v8  ;;  %v2976_v19 = vcombine.low %v932_v7, %v936_v8  ;;  %v733_v7 = vld [vmem:[#allocation7 + $0x190] sm:$0xff] }
 0x221   :  { %v737_v8 = vld [vmem:[#allocation7 + $0x1b0] sm:$0xff] }
 0x222   :  { %2319 = vmatpush1.bf16.msra.mxu1 %v2918_v15  ;;  %2401 = vmatpush1.bf16.msra.mxu0 %v2920_v16  ;;  %v685_v15 = vld [vmem:[#allocation7 + $0x10] sm:$0xff]  ;;  %v686_v16 = vld [vmem:[#allocation7 + $0x18] sm:$0xff] }
 0x223   :  { %2320 = vmatprep.subr.bf16.mxu1 %v2927_v17  ;;  %2402 = vmatprep.subr.bf16.mxu0 %v2929_v18  ;;  %v690_v17 = vld [vmem:[#allocation7 + $0x38] sm:$0xff]  ;;  %v2974_v18 = vcombine.low %v931_v3, %v935_v4  ;;  %v2731_v21 = vcombine.high %v685_v15, %v689_v46 }
 0x224   :  { %v2733_v22 = vcombine.high %v686_v16, %v690_v17  ;;  %v2732_v31 = vcombine.low %v686_v16, %v690_v17  ;;  %v745_v16 = vld [vmem:[#allocation7 + $0x1f0] sm:$0xff]  ;;  %v742_v17 = vld [vmem:[#allocation7 + $0x1d8] sm:$0xff] }
 0x226   :  { %2321 = vmatpush1.bf16.msra.mxu1 %v2926_v23  ;;  %2403 = vmatpush1.bf16.msra.mxu0 %v2928_v26  ;;  %v693_v23 = vld [vmem:[#allocation7 + $0x50] sm:$0xff] }
 0x227   :  { %2322 = vmatprep.subr.bf16.mxu1 %v2935_v28  ;;  %2404 = vmatprep.subr.bf16.mxu0 %v2937_v29  ;;  %v697_v26 = vld [vmem:[#allocation7 + $0x70] sm:$0xff]  ;;  %v698_v28 = vld [vmem:[#allocation7 + $0x78] sm:$0xff]  ;;  %v2730_v29 = vcombine.low %v685_v15, %v689_v46 }
 0x228   :  { %v2739_v32 = vcombine.high %v693_v23, %v697_v26  ;;  %v2741_v33 = vcombine.high %v694_v52, %v698_v28  ;;  %v2738_v38 = vcombine.low %v693_v23, %v697_v26  ;;  %v2740_v39 = vcombine.low %v694_v52, %v698_v28  ;;  %v741_v46 = vld [vmem:[#allocation7 + $0x1d0] sm:$0xff]  ;;  %v750_v52 = vld [vmem:[#allocation7 + $0x218] sm:$0xff] }
 0x229   :  { %v749_v23 = vld [vmem:[#allocation7 + $0x210] sm:$0xff]  ;;  %v754_v28 = vld [vmem:[#allocation7 + $0x238] sm:$0xff] }
 0x22a   :  { %2323 = vmatpush1.bf16.msra.mxu1 %v2934_v34  ;;  %2405 = vmatpush1.bf16.msra.mxu0 %v2936_v35  ;;  %v701_v34 = vld [vmem:[#allocation7 + $0x90] sm:$0xff] }
 0x22b   :  { %2324 = vmatprep.subr.bf16.mxu1 %v2943_v36  ;;  %2406 = vmatprep.subr.bf16.mxu0 %v2945_v37  ;;  %v705_v35 = vld [vmem:[#allocation7 + $0xb0] sm:$0xff]  ;;  %v702_v36 = vld [vmem:[#allocation7 + $0x98] sm:$0xff] }
 0x22c   :  { %v706_v37 = vld [vmem:[#allocation7 + $0xb8] sm:$0xff]  ;;  %v2747_v40 = vcombine.high %v701_v34, %v705_v35  ;;  %v2746_v48 = vcombine.low %v701_v34, %v705_v35  ;;  %v753_v26 = vld [vmem:[#allocation7 + $0x230] sm:$0xff] }
 0x22d   :  { %v2749_v41 = vcombine.high %v702_v36, %v706_v37  ;;  %v2748_v49 = vcombine.low %v702_v36, %v706_v37  ;;  %v757_v34 = vld [vmem:[#allocation7 + $0x250] sm:$0xff]  ;;  %v758_v36 = vld [vmem:[#allocation7 + $0x258] sm:$0xff] }
 0x22e   :  { %2325 = vmatpush1.bf16.msra.mxu1 %v2942_v42  ;;  %2407 = vmatpush1.bf16.msra.mxu0 %v2944_v43  ;;  %v709_v42 = vld [vmem:[#allocation7 + $0xd0] sm:$0xff]  ;;  %v762_v37 = vld [vmem:[#allocation7 + $0x278] sm:$0xff] }
 0x22f   :  { %2326 = vmatprep.subr.bf16.mxu1 %v2951_v44  ;;  %2408 = vmatprep.subr.bf16.mxu0 %v2953_v45  ;;  %v713_v43 = vld [vmem:[#allocation7 + $0xf0] sm:$0xff]  ;;  %v710_v44 = vld [vmem:[#allocation7 + $0xd8] sm:$0xff] }
 0x230   :  { %v714_v45 = vld [vmem:[#allocation7 + $0xf8] sm:$0xff]  ;;  %v2755_v50 = vcombine.high %v709_v42, %v713_v43  ;;  %v761_v35 = vld [vmem:[#allocation7 + $0x270] sm:$0xff] }
 0x231   :  { %v2757_v51 = vcombine.high %v710_v44, %v714_v45  ;;  %v2756_v58 = vcombine.low %v710_v44, %v714_v45  ;;  %v766_v44 = vld [vmem:[#allocation7 + $0x298] sm:$0xff] }
 0x232   :  { %2327 = vmatpush1.bf16.msra.mxu1 %v2950_v53  ;;  %2409 = vmatpush1.bf16.msra.mxu0 %v2952_v54  ;;  %v717_v53 = vld [vmem:[#allocation7 + $0x110] sm:$0xff]  ;;  %v770_v45 = vld [vmem:[#allocation7 + $0x2b8] sm:$0xff] }
 0x233   :  { %2328 = vmatprep.subr.bf16.mxu1 %v2959_v56  ;;  %2410 = vmatprep.subr.bf16.mxu0 %v2961_v57  ;;  %v721_v54 = vld [vmem:[#allocation7 + $0x130] sm:$0xff]  ;;  %v722_v56 = vld [vmem:[#allocation7 + $0x138] sm:$0xff]  ;;  %v2754_v57 = vcombine.low %v709_v42, %v713_v43 }
 0x234   :  { %v2763_v59 = vcombine.high %v717_v53, %v721_v54  ;;  %v765_v42 = vld [vmem:[#allocation7 + $0x290] sm:$0xff] }
 0x235   :  { %v769_v43 = vld [vmem:[#allocation7 + $0x2b0] sm:$0xff] }
 0x236   :  { %2329 = vmatpush1.bf16.msra.mxu1 %v2958_v62  ;;  %2411 = vmatpush1.bf16.msra.mxu0 %v2960_v63  ;;  %v729_v62 = vld [vmem:[#allocation7 + $0x170] sm:$0xff]  ;;  %v726_v63 = vld [vmem:[#allocation7 + $0x158] sm:$0xff] }
 0x237   :  { %2330 = vmatprep.subr.bf16.mxu1 %v2967_v1  ;;  %2412 = vmatprep.subr.bf16.mxu0 %v2969_v2  ;;  %v2762_v1 = vcombine.low %v717_v53, %v721_v54  ;;  %v2771_v3 = vcombine.high %v725_v61, %v729_v62  ;;  %v2773_v4 = vcombine.high %v726_v63, %v730_v0  ;;  %v773_v53 = vld [vmem:[#allocation7 + $0x2d0] sm:$0xff] }
 0x238   :  { %v2770_v11 = vcombine.low %v725_v61, %v729_v62  ;;  %v777_v54 = vld [vmem:[#allocation7 + $0x2f0] sm:$0xff] }
 0x239   :  { %v781_v61 = vld [vmem:[#allocation7 + $0x310] sm:$0xff] }
 0x23a   :  { %2331 = vmatpush1.bf16.msra.mxu1 %v2966_v9  ;;  %2413 = vmatpush1.bf16.msra.mxu0 %v2968_v10  ;;  %v734_v9 = vld [vmem:[#allocation7 + $0x198] sm:$0xff]  ;;  %v785_v62 = vld [vmem:[#allocation7 + $0x330] sm:$0xff] }
 0x23b   :  { %2332 = vmatprep.subr.bf16.mxu1 %v2975_v12  ;;  %2414 = vmatprep.subr.bf16.mxu0 %v2977_v14  ;;  %v738_v10 = vld [vmem:[#allocation7 + $0x1b8] sm:$0xff]  ;;  %v2772_v12 = vcombine.low %v726_v63, %v730_v0  ;;  %v2779_v14 = vcombine.high %v733_v7, %v737_v8 }
 0x23c   :  { %v2781_v15 = vcombine.high %v734_v9, %v738_v10  ;;  %v2780_v20 = vcombine.low %v734_v9, %v738_v10  ;;  %v782_v63 = vld [vmem:[#allocation7 + $0x318] sm:$0xff] }
 0x23d   :  { %v786_v0 = vld [vmem:[#allocation7 + $0x338] sm:$0xff] }
 0x23e   :  { %2333 = vmatpush1.bf16.msra.mxu1 %v2974_v18  ;;  %2415 = vmatpush1.bf16.msra.mxu0 %v2976_v19  ;;  %v746_v18 = vld [vmem:[#allocation7 + $0x1f8] sm:$0xff]  ;;  %v2778_v19 = vcombine.low %v733_v7, %v737_v8  ;;  %v789_v7 = vld [vmem:[#allocation7 + $0x350] sm:$0xff] }
 0x23f   :  { %2425 = vmatprep.subr.bf16.mxu1 %v2731_v21  ;;  %2507 = vmatprep.subr.bf16.mxu0 %v2733_v22  ;;  %v2787_v21 = vcombine.high %v741_v46, %v745_v16  ;;  %v2789_v22 = vcombine.high %v742_v17, %v746_v18  ;;  %v793_v8 = vld [vmem:[#allocation7 + $0x370] sm:$0xff]  ;;  %v790_v9 = vld [vmem:[#allocation7 + $0x358] sm:$0xff] }
 0x240   :  { %v794_v10 = vld [vmem:[#allocation7 + $0x378] sm:$0xff] }
 0x241   :  { %2335 = vmatmul.mubr.bf16.vlgmr.msra.gmra.mrb[4].mxu1 %v3388_v30  ;;  %2417 = vmatmul.mubr.bf16.vlgmr.msra.gmra.mrb[8].mxu0 %v3388_v30 }
 0x242   :  { %2426 = vmatpush1.bf16.msra.mxu1 %v2730_v29  ;;  %2457 = vmatprep.mubr.bf16.mxu1 %v3371_v5  ;;  %v2786_v29 = vcombine.low %v741_v46, %v745_v16  ;;  %v797_v46 = vld [vmem:[#allocation7 + $0x390] sm:$0xff] }
 0x243   :  { %2508 = vmatpush1.bf16.msra.mxu0 %v2732_v31  ;;  %2539 = vmatprep.mubr.bf16.mxu0 %v3371_v5  ;;  %v718_v5 = vld [vmem:[#allocation7 + $0x118] sm:$0xff]  ;;  %v2788_v31 = vcombine.low %v742_v17, %v746_v18  ;;  %v801_v16 = vld [vmem:[#allocation7 + $0x3b0] sm:$0xff] }
 0x244   :  { %2427 = vmatprep.subr.bf16.mxu1 %v2739_v32  ;;  %2509 = vmatprep.subr.bf16.mxu0 %v2741_v33  ;;  %v2765_v60 = vcombine.high %v718_v5, %v722_v56  ;;  %v2764_v2 = vcombine.low %v718_v5, %v722_v56  ;;  %v2795_v32 = vcombine.high %v749_v23, %v753_v26  ;;  %v774_v5 = vld [vmem:[#allocation7 + $0x2d8] sm:$0xff] }
 0x245   :  { %v2797_v33 = vcombine.high %v750_v52, %v754_v28  ;;  %v778_v56 = vld [vmem:[#allocation7 + $0x2f8] sm:$0xff] }
 0x246   :  { %2428 = vmatpush1.bf16.msra.mxu1 %v2738_v38  ;;  %v2794_v38 = vcombine.low %v749_v23, %v753_v26  ;;  %v798_v17 = vld [vmem:[#allocation7 + $0x398] sm:$0xff]  ;;  %v805_v23 = vld [vmem:[#allocation7 + $0x3d0] sm:$0xff] }
 0x247   :  { %2510 = vmatpush1.bf16.msra.mxu0 %v2740_v39  ;;  %2429 = vmatprep.subr.bf16.mxu1 %v2747_v40  ;;  %v2796_v39 = vcombine.low %v750_v52, %v754_v28  ;;  %v2803_v40 = vcombine.high %v757_v34, %v761_v35  ;;  %v802_v18 = vld [vmem:[#allocation7 + $0x3b8] sm:$0xff]  ;;  %v809_v26 = vld [vmem:[#allocation7 + $0x3f0] sm:$0xff] }
 0x248   :  { %2511 = vmatprep.subr.bf16.mxu0 %v2749_v41  ;;  %v2805_v41 = vcombine.high %v758_v36, %v762_v37  ;;  %v806_v52 = vld [vmem:[#allocation7 + $0x3d8] sm:$0xff] }
 0x249   :  { %v810_v28 = vld [vmem:[#allocation7 + $0x3f8] sm:$0xff] }
 0x24a   :  { %2430 = vmatpush1.bf16.msra.mxu1 %v2746_v48  ;;  %v2802_v48 = vcombine.low %v757_v34, %v761_v35  ;;  %v813_v34 = vld [vmem:[#allocation7 + $0x410] sm:$0xff] }
 0x24b   :  { %2512 = vmatpush1.bf16.msra.mxu0 %v2748_v49  ;;  %2431 = vmatprep.subr.bf16.mxu1 %v2755_v50  ;;  %v2804_v49 = vcombine.low %v758_v36, %v762_v37  ;;  %v2811_v50 = vcombine.high %v765_v42, %v769_v43  ;;  %v817_v35 = vld [vmem:[#allocation7 + $0x430] sm:$0xff]  ;;  %v814_v36 = vld [vmem:[#allocation7 + $0x418] sm:$0xff] }
 0x24c   :  { %2513 = vmatprep.subr.bf16.mxu0 %v2757_v51  ;;  %v2813_v51 = vcombine.high %v766_v44, %v770_v45  ;;  %v818_v37 = vld [vmem:[#allocation7 + $0x438] sm:$0xff] }
 0x24e   :  { %2432 = vmatpush1.bf16.msra.mxu1 %v2754_v57  ;;  %v2810_v57 = vcombine.low %v765_v42, %v769_v43  ;;  %v821_v42 = vld [vmem:[#allocation7 + $0x450] sm:$0xff] }
 0x24f   :  { %2514 = vmatpush1.bf16.msra.mxu0 %v2756_v58  ;;  %2433 = vmatprep.subr.bf16.mxu1 %v2763_v59  ;;  %v2812_v58 = vcombine.low %v766_v44, %v770_v45  ;;  %v2819_v59 = vcombine.high %v773_v53, %v777_v54  ;;  %v825_v43 = vld [vmem:[#allocation7 + $0x470] sm:$0xff]  ;;  %v2858_v44 = vcombine.low %v813_v34, %v817_v35  ;;  %v822_v45 = vld [vmem:[#allocation7 + $0x458] sm:$0xff] }
 0x250   :  { %2515 = vmatprep.subr.bf16.mxu0 %v2765_v60  ;;  %v2821_v60 = vcombine.high %v774_v5, %v778_v56 }
 0x252   :  { %2434 = vmatpush1.bf16.msra.mxu1 %v2762_v1  ;;  %v2818_v1 = vcombine.low %v773_v53, %v777_v54  ;;  %v833_v53 = vld [vmem:[#allocation7 + $0x4b0] sm:$0xff] }
 0x253   :  { %2516 = vmatpush1.bf16.msra.mxu0 %v2764_v2  ;;  %2435 = vmatprep.subr.bf16.mxu1 %v2771_v3  ;;  %v2820_v2 = vcombine.low %v774_v5, %v778_v56  ;;  %v2827_v3 = vcombine.high %v781_v61, %v785_v62  ;;  %v830_v5 = vld [vmem:[#allocation7 + $0x498] sm:$0xff] }
 0x254   :  { %2517 = vmatprep.subr.bf16.mxu0 %v2773_v4  ;;  %v2829_v4 = vcombine.high %v782_v63, %v786_v0  ;;  %v834_v56 = vld [vmem:[#allocation7 + $0x4b8] sm:$0xff] }
 0x256   :  { %2436 = vmatpush1.bf16.msra.mxu1 %v2770_v11  ;;  %v2826_v11 = vcombine.low %v781_v61, %v785_v62  ;;  %v837_v61 = vld [vmem:[#allocation7 + $0x4d0] sm:$0xff] }
 0x257   :  { %2518 = vmatpush1.bf16.msra.mxu0 %v2772_v12  ;;  %2437 = vmatprep.subr.bf16.mxu1 %v2779_v14  ;;  %v2828_v12 = vcombine.low %v782_v63, %v786_v0  ;;  %v2835_v14 = vcombine.high %v789_v7, %v793_v8  ;;  %v841_v62 = vld [vmem:[#allocation7 + $0x4f0] sm:$0xff]  ;;  %v838_v63 = vld [vmem:[#allocation7 + $0x4d8] sm:$0xff] }
 0x258   :  { %2519 = vmatprep.subr.bf16.mxu0 %v2781_v15  ;;  %v2837_v15 = vcombine.high %v790_v9, %v794_v10  ;;  %v842_v0 = vld [vmem:[#allocation7 + $0x4f8] sm:$0xff] }
 0x25a   :  { %2438 = vmatpush1.bf16.msra.mxu1 %v2778_v19  ;;  %v2834_v19 = vcombine.low %v789_v7, %v793_v8  ;;  %v849_v7 = vld [vmem:[#allocation7 + $0x530] sm:$0xff]  ;;  %v846_v8 = vld [vmem:[#allocation7 + $0x518] sm:$0xff] }
 0x25b   :  { %2520 = vmatpush1.bf16.msra.mxu0 %v2780_v20  ;;  %2439 = vmatprep.subr.bf16.mxu1 %v2787_v21  ;;  %v2836_v20 = vcombine.low %v790_v9, %v794_v10  ;;  %v2843_v21 = vcombine.high %v797_v46, %v801_v16  ;;  %v850_v9 = vld [vmem:[#allocation7 + $0x538] sm:$0xff]  ;;  %v2884_v10 = vcombine.low %v838_v63, %v842_v0 }
 0x25c   :  { %2521 = vmatprep.subr.bf16.mxu0 %v2789_v22  ;;  %v2845_v22 = vcombine.high %v798_v17, %v802_v18 }
 0x25e   :  { %2440 = vmatpush1.bf16.msra.mxu1 %v2786_v29  ;;  %v2842_v29 = vcombine.low %v797_v46, %v801_v16  ;;  %v854_v46 = vld [vmem:[#allocation7 + $0x558] sm:$0xff] }
 0x25f   :  { %2522 = vmatpush1.bf16.msra.mxu0 %v2788_v31  ;;  %2441 = vmatprep.subr.bf16.mxu1 %v2795_v32  ;;  %v2844_v31 = vcombine.low %v798_v17, %v802_v18  ;;  %v2851_v32 = vcombine.high %v805_v23, %v809_v26  ;;  %v858_v16 = vld [vmem:[#allocation7 + $0x578] sm:$0xff]  ;;  %v2892_v18 = vcombine.low %v846_v8, %v850_v9 }
 0x260   :  { %2523 = vmatprep.subr.bf16.mxu0 %v2797_v33  ;;  %v2853_v33 = vcombine.high %v806_v52, %v810_v28 }
 0x262   :  { %2442 = vmatpush1.bf16.msra.mxu1 %v2794_v38  ;;  %v2850_v38 = vcombine.low %v805_v23, %v809_v26  ;;  %v862_v23 = vld [vmem:[#allocation7 + $0x598] sm:$0xff] }
 0x263   :  { %2524 = vmatpush1.bf16.msra.mxu0 %v2796_v39  ;;  %2443 = vmatprep.subr.bf16.mxu1 %v2803_v40  ;;  %v2852_v39 = vcombine.low %v806_v52, %v810_v28  ;;  %v2859_v40 = vcombine.high %v813_v34, %v817_v35  ;;  %v866_v26 = vld [vmem:[#allocation7 + $0x5b8] sm:$0xff]  ;;  %v2900_v28 = vcombine.low %v854_v46, %v858_v16 }
 0x264   :  { %2525 = vmatprep.subr.bf16.mxu0 %v2805_v41  ;;  %v2861_v41 = vcombine.high %v814_v36, %v818_v37  ;;  %v870_v34 = vld [vmem:[#allocation7 + $0x5d8] sm:$0xff] }
 0x265   :  { %v874_v35 = vld [vmem:[#allocation7 + $0x5f8] sm:$0xff] }
 0x266   :  { %2444 = vmatpush1.bf16.msra.mxu1 %v2802_v48  ;;  %v826_v48 = vld [vmem:[#allocation7 + $0x478] sm:$0xff] }
 0x267   :  { %2526 = vmatpush1.bf16.msra.mxu0 %v2804_v49  ;;  %2445 = vmatprep.subr.bf16.mxu1 %v2811_v50  ;;  %v2860_v49 = vcombine.low %v814_v36, %v818_v37  ;;  %v2867_v50 = vcombine.high %v821_v42, %v825_v43  ;;  %v2869_v54 = vcombine.high %v822_v45, %v826_v48 }
 0x268   :  { %2527 = vmatprep.subr.bf16.mxu0 %v2813_v51  ;;  %v829_v51 = vld [vmem:[#allocation7 + $0x490] sm:$0xff]  ;;  %v2908_v37 = vcombine.low %v862_v23, %v866_v26 }
 0x26a   :  { %2446 = vmatpush1.bf16.msra.mxu1 %v2810_v57  ;;  %v2866_v57 = vcombine.low %v821_v42, %v825_v43  ;;  %v878_v42 = vld [vmem:[#allocation7 + $0x618] sm:$0xff] }
 0x26b   :  { %2528 = vmatpush1.bf16.msra.mxu0 %v2812_v58  ;;  %2447 = vmatprep.subr.bf16.mxu1 %v2819_v59  ;;  %v2868_v58 = vcombine.low %v822_v45, %v826_v48  ;;  %v2875_v59 = vcombine.high %v829_v51, %v833_v53  ;;  %v882_v43 = vld [vmem:[#allocation7 + $0x638] sm:$0xff]  ;;  %v2916_v45 = vcombine.low %v870_v34, %v874_v35 }
 0x26c   :  { %2529 = vmatprep.subr.bf16.mxu0 %v2821_v60  ;;  %v2877_v60 = vcombine.high %v830_v5, %v834_v56 }
 0x26e   :  { %2448 = vmatpush1.bf16.msra.mxu1 %v2818_v1  ;;  %v2874_v1 = vcombine.low %v829_v51, %v833_v53  ;;  %v889_v51 = vld [vmem:[#allocation7 + $0x670] sm:$0xff]  ;;  %v886_v53 = vld [vmem:[#allocation7 + $0x658] sm:$0xff] }
 0x26f   :  { %2530 = vmatpush1.bf16.msra.mxu0 %v2820_v2  ;;  %2449 = vmatprep.subr.bf16.mxu1 %v2827_v3  ;;  %v2883_v2 = vcombine.high %v837_v61, %v841_v62  ;;  %v2885_v3 = vcombine.high %v838_v63, %v842_v0 }
 0x270   :  { %2531 = vmatprep.subr.bf16.mxu0 %v2829_v4  ;;  %v845_v4 = vld [vmem:[#allocation7 + $0x510] sm:$0xff] }
 0x271   :  { %v2890_v17 = vcombine.low %v845_v4, %v849_v7 }
 0x272   :  { %2450 = vmatpush1.bf16.msra.mxu1 %v2826_v11  ;;  %v2891_v11 = vcombine.high %v845_v4, %v849_v7  ;;  %v902_v4 = vld [vmem:[#allocation7 + $0x6d8] sm:$0xff] }
 0x273   :  { %2532 = vmatpush1.bf16.msra.mxu0 %v2828_v12  ;;  %2451 = vmatprep.subr.bf16.mxu1 %v2835_v14  ;;  %v2893_v12 = vcombine.high %v846_v8, %v850_v9  ;;  %v853_v14 = vld [vmem:[#allocation7 + $0x550] sm:$0xff]  ;;  %v906_v7 = vld [vmem:[#allocation7 + $0x6f8] sm:$0xff] }
 0x274   :  { %2533 = vmatprep.subr.bf16.mxu0 %v2837_v15  ;;  %v857_v15 = vld [vmem:[#allocation7 + $0x570] sm:$0xff] }
 0x275   :  { %v2898_v52 = vcombine.low %v853_v14, %v857_v15 }
 0x276   :  { %2452 = vmatpush1.bf16.msra.mxu1 %v2834_v19  ;;  %v2899_v19 = vcombine.high %v853_v14, %v857_v15  ;;  %v910_v14 = vld [vmem:[#allocation7 + $0x718] sm:$0xff] }
 0x277   :  { %2534 = vmatpush1.bf16.msra.mxu0 %v2836_v20  ;;  %2453 = vmatprep.subr.bf16.mxu1 %v2843_v21  ;;  %v2901_v20 = vcombine.high %v854_v46, %v858_v16  ;;  %v861_v21 = vld [vmem:[#allocation7 + $0x590] sm:$0xff]  ;;  %v914_v15 = vld [vmem:[#allocation7 + $0x738] sm:$0xff]  ;;  %v2948_v16 = vcombine.low %v902_v4, %v906_v7 }
 0x278   :  { %2535 = vmatprep.subr.bf16.mxu0 %v2845_v22  ;;  %v865_v22 = vld [vmem:[#allocation7 + $0x5b0] sm:$0xff] }
 0x279   :  { %v2906_v36 = vcombine.low %v861_v21, %v865_v22 }
 0x27a   :  { %2454 = vmatpush1.bf16.msra.mxu1 %v2842_v29  ;;  %v2907_v29 = vcombine.high %v861_v21, %v865_v22  ;;  %v918_v21 = vld [vmem:[#allocation7 + $0x758] sm:$0xff] }
 0x27b   :  { %2536 = vmatpush1.bf16.msra.mxu0 %v2844_v31  ;;  %2455 = vmatprep.subr.bf16.mxu1 %v2851_v32  ;;  %v2909_v31 = vcombine.high %v862_v23, %v866_v26  ;;  %v869_v32 = vld [vmem:[#allocation7 + $0x5d0] sm:$0xff]  ;;  %v922_v22 = vld [vmem:[#allocation7 + $0x778] sm:$0xff]  ;;  %v2956_v26 = vcombine.low %v910_v14, %v914_v15 }
 0x27c   :  { %2537 = vmatprep.subr.bf16.mxu0 %v2853_v33  ;;  %v873_v33 = vld [vmem:[#allocation7 + $0x5f0] sm:$0xff] }
 0x27e   :  { %2456 = vmatpush1.bf16.msra.mxu1 %v2850_v38  ;;  %v2915_v38 = vcombine.high %v869_v32, %v873_v33 }
 0x27f   :  { %2538 = vmatpush1.bf16.msra.mxu0 %v2852_v39  ;;  %2466 = vmatprep.subr.bf16.mxu1 %v2859_v40  ;;  %v2917_v39 = vcombine.high %v870_v34, %v874_v35  ;;  %v877_v40 = vld [vmem:[#allocation7 + $0x610] sm:$0xff]  ;;  %v2964_v35 = vcombine.low %v918_v21, %v922_v22 }
 0x280   :  { %2548 = vmatprep.subr.bf16.mxu0 %v2861_v41  ;;  %v881_v41 = vld [vmem:[#allocation7 + $0x630] sm:$0xff] }
 0x281   :  { %2458 = vmatmul.mubr.bf16.vlgmr.msra.gmra.mrb[8].mxu1 %v3373_v6  ;;  %v2923_v48 = vcombine.high %v877_v40, %v881_v41 }
 0x282   :  { %2540 = vmatmul.mubr.bf16.vlgmr.msra.gmra.mrb[12].mxu0 %v3373_v6  ;;  %2467 = vmatpush1.bf16.msra.mxu1 %v2858_v44  ;;  %v2876_v6 = vcombine.low %v830_v5, %v834_v56  ;;  %v2914_v44 = vcombine.low %v869_v32, %v873_v33  ;;  %v2922_v5 = vcombine.low %v877_v40, %v881_v41  ;;  %v926_v32 = vld [vmem:[#allocation7 + $0x798] sm:$0xff] }
 0x283   :  { %2498 = vmatprep.mubr.bf16.mxu1 %v3377_v13  ;;  %2549 = vmatpush1.bf16.msra.mxu0 %v2860_v49  ;;  %v2925_v49 = vcombine.high %v878_v42, %v882_v43  ;;  %v2924_v56 = vcombine.low %v878_v42, %v882_v43  ;;  %v930_v33 = vld [vmem:[#allocation7 + $0x7b8] sm:$0xff] }
 0x284   :  { %2580 = vmatprep.mubr.bf16.mxu0 %v3377_v13  ;;  %2468 = vmatprep.subr.bf16.mxu1 %v2867_v50  ;;  %v2882_v13 = vcombine.low %v837_v61, %v841_v62  ;;  %v885_v50 = vld [vmem:[#allocation7 + $0x650] sm:$0xff]  ;;  %v894_v61 = vld [vmem:[#allocation7 + $0x698] sm:$0xff]  ;;  %v2972_v43 = vcombine.low %v926_v32, %v930_v33 }
 0x285   :  { %2550 = vmatprep.subr.bf16.mxu0 %v2869_v54  ;;  %v890_v54 = vld [vmem:[#allocation7 + $0x678] sm:$0xff]  ;;  %v2930_v63 = vcombine.low %v885_v50, %v889_v51 }
 0x286   :  { %2469 = vmatpush1.bf16.msra.mxu1 %v2866_v57  ;;  %v2931_v57 = vcombine.high %v885_v50, %v889_v51  ;;  %v898_v62 = vld [vmem:[#allocation7 + $0x6b8] sm:$0xff]  ;;  %v2932_v0 = vcombine.low %v886_v53, %v890_v54 }
 0x287   :  { %2551 = vmatpush1.bf16.msra.mxu0 %v2868_v58  ;;  %2470 = vmatprep.subr.bf16.mxu1 %v2875_v59  ;;  %v2933_v58 = vcombine.high %v886_v53, %v890_v54  ;;  %v893_v59 = vld [vmem:[#allocation7 + $0x690] sm:$0xff]  ;;  %v2940_v9 = vcombine.low %v894_v61, %v898_v62  ;;  %v934_v40 = vld [vmem:[#allocation7 + $0x7d8] sm:$0xff] }
 0x288   :  { %2552 = vmatprep.subr.bf16.mxu0 %v2877_v60  ;;  %v897_v60 = vld [vmem:[#allocation7 + $0x6b0] sm:$0xff]  ;;  %v938_v41 = vld [vmem:[#allocation7 + $0x7f8] sm:$0xff] }
 0x289   :  { %v2938_v8 = vcombine.low %v893_v59, %v897_v60  ;;  %v939_v50 = vld [vmem:[%s3431_s6] sm:$0xff]  ;;  %s3263_s6 = smov [#allocation8]  }
 0x28a   :  { %2471 = vmatpush1.bf16.msra.mxu1 %v2874_v1  ;;  %v2939_v1 = vcombine.high %v893_v59, %v897_v60  ;;  %v944_v51 = vrot.slane %v939_v50, %v3346_v25  ;;  %v952_v53 = vrot.slane %v939_v50, %v263_v55  ;;  %v948_v54 = vrot.slane %v939_v50, %v3352_v27  ;;  %s2643_s22 = sshll.u32 %s3263_s6, 4  ;;  %s2644_s22 = int_to_ptr.vmem [resolvable:$true] %s2643_s22 }
 0x28b   :  { %2553 = vmatpush1.bf16.msra.mxu0 %v2876_v6  ;;  %2472 = vmatprep.subr.bf16.mxu1 %v2883_v2  ;;  %v2941_v6 = vcombine.high %v894_v61, %v898_v62  ;;  %v901_v2 = vld [vmem:[#allocation7 + $0x6d0] sm:$0xff]  ;;  %s3224_s23 = scalar_lea.vmem %s2644_s22, 1024  ;;  %p3229_p11 = scmp.lt.s32.totalorder %s2644_s22, %s2644_s22 }
 0x28c   :  { %2554 = vmatprep.subr.bf16.mxu0 %v2885_v3  ;;  %v905_v3 = vld [vmem:[#allocation7 + $0x6f0] sm:$0xff]  ;;  %p3225_p10 = scmp.ne.s32.totalorder %s2644_s22, %s3224_s23  ;;  %p3230_p12 = scmp.lt.s32.totalorder %s3224_s23, %s3224_s23 }
 0x28d   :  { %v2946_v46 = vcombine.low %v901_v2, %v905_v3 }
 0x28e   :  { %2473 = vmatpush1.bf16.msra.mxu1 %v2882_v13  ;;  %v2947_v13 = vcombine.high %v901_v2, %v905_v3  ;;  %p3231_p13 = por %p3230_p12, %p3229_p11 }
 0x28f   :  { %2555 = vmatpush1.bf16.msra.mxu0 %v2884_v10  ;;  %2474 = vmatprep.subr.bf16.mxu1 %v2891_v11  ;;  %v2949_v10 = vcombine.high %v902_v4, %v906_v7  ;;  %v909_v11 = vld [vmem:[#allocation7 + $0x710] sm:$0xff] }
 0x290   :  { %2556 = vmatprep.subr.bf16.mxu0 %v2893_v12  ;;  %v913_v12 = vld [vmem:[#allocation7 + $0x730] sm:$0xff]  ;;  %p3232_p0 = pnand %p3231_p13, %p3225_p10 }
 0x291   :  { %v2954_v23 = vcombine.low %v909_v11, %v913_v12 }
 0x292   :  { %2475 = vmatpush1.bf16.msra.mxu1 %v2890_v17  ;;  %v2955_v17 = vcombine.high %v909_v11, %v913_v12 }
 0x293   :  { %2557 = vmatpush1.bf16.msra.mxu0 %v2892_v18  ;;  %2476 = vmatprep.subr.bf16.mxu1 %v2899_v19  ;;  %v2957_v18 = vcombine.high %v910_v14, %v914_v15  ;;  %v917_v19 = vld [vmem:[#allocation7 + $0x750] sm:$0xff] }
 0x294   :  { %2558 = vmatprep.subr.bf16.mxu0 %v2901_v20  ;;  %v921_v20 = vld [vmem:[#allocation7 + $0x770] sm:$0xff] }
 0x295   :  { %v2962_v34 = vcombine.low %v917_v19, %v921_v20 }
 0x296   :  { %2477 = vmatpush1.bf16.msra.mxu1 %v2898_v52  ;;  %v2963_v52 = vcombine.high %v917_v19, %v921_v20  ;;  %v959_v19 = vsub.s32 4, %v3343_v24  ;;  %v967_v20 = vsub.s32 6, %v3343_v24 }
 0x297   :  { %2559 = vmatpush1.bf16.msra.mxu0 %v2900_v28  ;;  %2478 = vmatprep.subr.bf16.mxu1 %v2907_v29  ;;  %v2965_v28 = vcombine.high %v918_v21, %v922_v22  ;;  %v925_v29 = vld [vmem:[#allocation7 + $0x790] sm:$0xff]  ;;  %v963_v21 = vsub.s32 5, %v3343_v24  ;;  %v971_v22 = vsub.s32 7, %v3343_v24 }
 0x298   :  { %2560 = vmatprep.subr.bf16.mxu0 %v2909_v31  ;;  %v929_v31 = vld [vmem:[#allocation7 + $0x7b0] sm:$0xff] }
 0x299   :  { %v2970_v42 = vcombine.low %v925_v29, %v929_v31 }
 0x29a   :  { %2479 = vmatpush1.bf16.msra.mxu1 %v2906_v36  ;;  %v2971_v36 = vcombine.high %v925_v29, %v929_v31 }
 0x29b   :  { %2561 = vmatpush1.bf16.msra.mxu0 %v2908_v37  ;;  %2480 = vmatprep.subr.bf16.mxu1 %v2915_v38  ;;  %v2973_v37 = vcombine.high %v926_v32, %v930_v33  ;;  %v933_v38 = vld [vmem:[#allocation7 + $0x7d0] sm:$0xff] }
 0x29c   :  { %2562 = vmatprep.subr.bf16.mxu0 %v2917_v39  ;;  %v937_v39 = vld [vmem:[#allocation7 + $0x7f0] sm:$0xff] }
 0x29e   :  { %2481 = vmatpush1.bf16.msra.mxu1 %v2914_v44  ;;  %v2979_v44 = vcombine.high %v933_v38, %v937_v39 }
 0x29f   :  { %2563 = vmatpush1.bf16.msra.mxu0 %v2916_v45  ;;  %2482 = vmatprep.subr.bf16.mxu1 %v2923_v48  ;;  %v2981_v45 = vcombine.high %v934_v40, %v938_v41  ;;  %v2978_v48 = vcombine.low %v933_v38, %v937_v39 }
 0x2a0   :  { %2564 = vmatprep.subr.bf16.mxu0 %v2925_v49  ;;  %v2980_v49 = vcombine.low %v934_v40, %v938_v41 }
 0x2a2   :  { %2483 = vmatpush1.bf16.msra.mxu1 %v2922_v5  ;;  %v956_v5 = vrot.slane %v939_v50, %v267_v47 }
 0x2a3   :  { %2565 = vmatpush1.bf16.msra.mxu0 %v2924_v56  ;;  %2484 = vmatprep.subr.bf16.mxu1 %v2931_v57 }
 0x2a4   :  { %2566 = vmatprep.subr.bf16.mxu0 %v2933_v58 }
 0x2a6   :  { %2485 = vmatpush1.bf16.msra.mxu1 %v2930_v63 }
 0x2a7   :  { %2567 = vmatpush1.bf16.msra.mxu0 %v2932_v0  ;;  %2486 = vmatprep.subr.bf16.mxu1 %v2939_v1 }
 0x2a8   :  { %2568 = vmatprep.subr.bf16.mxu0 %v2941_v6 }
 0x2aa   :  { %2487 = vmatpush1.bf16.msra.mxu1 %v2938_v8 }
 0x2ab   :  { %2569 = vmatpush1.bf16.msra.mxu0 %v2940_v9  ;;  %2488 = vmatprep.subr.bf16.mxu1 %v2947_v13 }
 0x2ac   :  { %2570 = vmatprep.subr.bf16.mxu0 %v2949_v10 }
 0x2ae   :  { %2489 = vmatpush1.bf16.msra.mxu1 %v2946_v46 }
 0x2af   :  { %2571 = vmatpush1.bf16.msra.mxu0 %v2948_v16  ;;  %2490 = vmatprep.subr.bf16.mxu1 %v2955_v17 }
 0x2b0   :  { %2572 = vmatprep.subr.bf16.mxu0 %v2957_v18 }
 0x2b2   :  { %2491 = vmatpush1.bf16.msra.mxu1 %v2954_v23  ;;  %v960_v23 = vrot.slane %v939_v50, %v959_v19 }
 0x2b3   :  { %2573 = vmatpush1.bf16.msra.mxu0 %v2956_v26  ;;  %2492 = vmatprep.subr.bf16.mxu1 %v2963_v52  ;;  %v968_v26 = vrot.slane %v939_v50, %v967_v20  ;;  %v964_v52 = vrot.slane %v939_v50, %v963_v21 }
 0x2b4   :  { %2574 = vmatprep.subr.bf16.mxu0 %v2965_v28  ;;  %v972_v28 = vrot.slane %v939_v50, %v971_v22 }
 0x2b6   :  { %2493 = vmatpush1.bf16.msra.mxu1 %v2962_v34 }
 0x2b7   :  { %2575 = vmatpush1.bf16.msra.mxu0 %v2964_v35  ;;  %2494 = vmatprep.subr.bf16.mxu1 %v2971_v36 }
 0x2b8   :  { %2576 = vmatprep.subr.bf16.mxu0 %v2973_v37 }
 0x2ba   :  { %2495 = vmatpush1.bf16.msra.mxu1 %v2970_v42 }
 0x2bb   :  { %2577 = vmatpush1.bf16.msra.mxu0 %v2972_v43  ;;  %2496 = vmatprep.subr.bf16.mxu1 %v2979_v44 }
 0x2bc   :  { %2578 = vmatprep.subr.bf16.mxu0 %v2981_v45 }
 0x2be   :  { %2497 = vmatpush1.bf16.msra.mxu1 %v2978_v48 }
 0x2bf   :  { %2579 = vmatpush1.bf16.msra.mxu0 %v2980_v49 }
 0x2c1   :  { %2499 = vmatmul.mubr.bf16.vlgmr.msra.gmra.mrb[8].mxu1 %v3388_v30 }
 0x2c2   :  { %2581 = vmatmul.mubr.bf16.vlgmr.msra.gmra.mrb[12].mxu0 %v3388_v30 }
 0x314   :  { %v2336_v56 = vpop.f32.mrb[4].mxu1  ;;  %v2418_v57 = vpop.f32.mrb[8].mxu0 }
 0x315   :  { %v2982_v58 = vadd.f32 %v2336_v56, %v944_v51  ;;  %v2984_v59 = vadd.f32 %v2418_v57, %v952_v53  ;;  %v2338_v60 = vpop.f32.mrb[5].mxu1  ;;  %v2420_v30 = vpop.f32.mrb[9].mxu0 }
 0x316   :  { %v2983_v61 = vadd.f32 %v2338_v60, %v948_v54  ;;  %v2985_v62 = vadd.f32 %v2420_v30, %v956_v5  ;;  %v2340_v63 = vpop.f32.mrb[6].mxu1  ;;  %v2422_v0 = vpop.f32.mrb[10].mxu0 }
 0x317   :  { %v2589_v1 = vsub.f32 0.0, %v2982_v58  ;;  %v2591_v25 = vsub.f32 0.0, %v2984_v59  ;;  %v2341_v6 = vpop.f32.mrb[7].mxu1  ;;  %v2423_v2 = vpop.f32.mrb[11].mxu0 }
 0x318   :  { %v2590_v55 = vsub.f32 0.0, %v2983_v61  ;;  %v2592_v3 = vsub.f32 0.0, %v2985_v62 }
 0x319   :  { %v2597_v27 = vmul.f32 1.442695, %v2589_v1  ;;  %v2601_v4 = vmul.f32 1.442695, %v2591_v25 }
 0x31a   :  { %v2599_v7 = vmul.f32 1.442695, %v2590_v55  ;;  %v2603_v47 = vmul.f32 1.442695, %v2592_v3 }
 0x31b   :  { %3126 = vpow2.f32 %v2597_v27 }
 0x31c   :  { %3128 = vpow2.f32 %v2601_v4 }
 0x31d   :  { %3130 = vpow2.f32 %v2599_v7 }
 0x31e   :  { %3132 = vpow2.f32 %v2603_v47 }
 0x325   :  { %v3127_v8 = vpop.eup %3126 }
 0x326   :  { %v3129_v9 = vpop.eup %3128  ;;  %v2613_v13 = vadd.f32 1.0, %v3127_v8 }
 0x327   :  { %v3131_v10 = vpop.eup %3130  ;;  %v2615_v11 = vadd.f32 1.0, %v3129_v9 }
 0x328   :  { %v3133_v12 = vpop.eup %3132  ;;  %3134 = vrcp.f32 %v2613_v13  ;;  %v2614_v14 = vadd.f32 1.0, %v3131_v10 }
 0x329   :  { %3136 = vrcp.f32 %v2615_v11  ;;  %v2616_v15 = vadd.f32 1.0, %v3133_v12 }
 0x32a   :  { %3138 = vrcp.f32 %v2614_v14 }
 0x32b   :  { %3140 = vrcp.f32 %v2616_v15 }
 0x332   :  { %v3135_v46 = vpop.eup %3134 }
 0x333   :  { %v3137_v16 = vpop.eup %3136  ;;  %2629 = vst [vmem:[#allocation8] sm:$0xff] %v3135_v46 }
 0x334   :  { %v3139_v17 = vpop.eup %3138  ;;  %2631 = vst [vmem:[#allocation8 + $0x10] sm:$0xff] %v3137_v16 }
 0x335   :  { %v3141_v18 = vpop.eup %3140  ;;  %2630 = vst [vmem:[#allocation8 + $0x8] sm:$0xff] %v3139_v17 }
 0x336   :  { %2632 = vst [vmem:[#allocation8 + $0x18] sm:$0xff] %v3141_v18 }
 0x394   :  { %v2500_v29 = vpop.f32.mrb[8].mxu1 }
 0x395   :  { %v2986_v31 = vadd.f32 %v2500_v29, %v960_v23  ;;  %v2582_v32 = vpop.f32.mrb[12].mxu0  ;;  %v2502_v33 = vpop.f32.mrb[9].mxu1 }
 0x396   :  { %v2988_v34 = vadd.f32 %v2582_v32, %v968_v26  ;;  %v2987_v35 = vadd.f32 %v2502_v33, %v964_v52  ;;  %v2584_v36 = vpop.f32.mrb[13].mxu0  ;;  %v2504_v37 = vpop.f32.mrb[10].mxu1 }
 0x397   :  { %v2593_v38 = vsub.f32 0.0, %v2986_v31  ;;  %v2989_v39 = vadd.f32 %v2584_v36, %v972_v28  ;;  %v2586_v40 = vpop.f32.mrb[14].mxu0  ;;  %v2505_v41 = vpop.f32.mrb[11].mxu1 }
 0x398   :  { %v2595_v42 = vsub.f32 0.0, %v2988_v34  ;;  %v2594_v43 = vsub.f32 0.0, %v2987_v35  ;;  %v2587_v44 = vpop.f32.mrb[15].mxu0 }
 0x399   :  { %v2605_v24 = vmul.f32 1.442695, %v2593_v38  ;;  %v2596_v45 = vsub.f32 0.0, %v2989_v39 }
 0x39a   :  { %v2609_v48 = vmul.f32 1.442695, %v2595_v42  ;;  %v2607_v49 = vmul.f32 1.442695, %v2594_v43 }
 0x39b   :  { %3142 = vpow2.f32 %v2605_v24  ;;  %v2611_v50 = vmul.f32 1.442695, %v2596_v45 }
 0x39c   :  { %3144 = vpow2.f32 %v2609_v48 }
 0x39d   :  { %3146 = vpow2.f32 %v2607_v49 }
 0x39e   :  { %3148 = vpow2.f32 %v2611_v50 }
 0x3a5   :  { %v3143_v51 = vpop.eup %3142 }
 0x3a6   :  { %v3145_v53 = vpop.eup %3144  ;;  %v2617_v54 = vadd.f32 1.0, %v3143_v51 }
 0x3a7   :  { %v3147_v5 = vpop.eup %3146  ;;  %v2619_v56 = vadd.f32 1.0, %v3145_v53 }
 0x3a8   :  { %v3149_v57 = vpop.eup %3148  ;;  %3150 = vrcp.f32 %v2617_v54  ;;  %v2618_v58 = vadd.f32 1.0, %v3147_v5 }
 0x3a9   :  { %3152 = vrcp.f32 %v2619_v56  ;;  %v2620_v59 = vadd.f32 1.0, %v3149_v57 }
 0x3aa   :  { %3154 = vrcp.f32 %v2618_v58 }
 0x3ab   :  { %3156 = vrcp.f32 %v2620_v59 }
 0x3b2   :  { %v3151_v60 = vpop.eup %3150 }
 0x3b3   :  { %v3153_v30 = vpop.eup %3152  ;;  %2633 = vst [vmem:[#allocation8 + $0x20] sm:$0xff] %v3151_v60 }
 0x3b4   :  { %v3155_v61 = vpop.eup %3154  ;;  %2635 = vst [vmem:[#allocation8 + $0x30] sm:$0xff] %v3153_v30 }
 0x3b5   :  { %v3157_v62 = vpop.eup %3156  ;;  %2634 = vst [vmem:[#allocation8 + $0x28] sm:$0xff] %v3155_v61 }
 0x3b6   :  { %2636 = vst [vmem:[#allocation8 + $0x38] sm:$0xff] %v3157_v62 }
 0x3b7   :  { %3235 = shalt.err (!%p3232_p0)
}
 0x3b8   :  { %s3236_s25 = scalar_lea.hbm %s3432_s7, 1024 }
 0x3b9   :  { %p3237_p1 = scmp.ne.s32.totalorder %s3432_s7, %s3236_s25  ;;  %p3240_p2 = scmp.lt.u32.totalorder %s3236_s25, %s3432_s7 }
 0x3bb   :  { %p3242_p3 = pnand %p3240_p2, %p3237_p1 }
 0x3bd   :  { %3245 = shalt.err (!%p3242_p3)
}
 0x3be   :  { %2646 = dma.vmem_to_hbm [thread:$0]  %s2644_s22, 1024, %s3432_s7, [#allocation4]  }
 0x3bf   :  { %3250 = dma.done.wait [#allocation4], 1024  }
 0x3c0   :  { %3251 = vsyncadd [#allocation4], 4294966272 }
 0x3c1   :  { %2650 = vsyncpa [#allocation3], 1 }
 0x3c2   :  { %2651 = vsyncpa [#allocation6], 1 }
 0x3c3   :  { %2652 = vsyncpa [#allocation4], 1 }

</bundles_post_ra>
